<compile_context>
chip_gen: v6e
topology: v6e:2x2x1
jax: 0.10.0
libtpu: 0.0.40
codegen_flags: <defaults>
</compile_context>

<pallas_src>
import jax
import jax.numpy as jnp
from jax import lax
from jax.experimental import pallas as pl
from jax.experimental.pallas import tpu as pltpu

NUM_LAYERS = 2  # Config.num_layers


# --------------------------- fused forward kernel ----------------------------
def _make_poetry_kernel(num_layers):
    """Build the fused kernel for a fixed (static) number of LSTM layers."""

    def kernel(*refs):
        n_in = 1 + 3 * num_layers + 4
        x_ref = refs[0]                                    # (S*B, E) f32
        layer_refs = refs[1:1 + 3 * num_layers]            # per layer: wih_t, whh_t, b
        wlin_ref, blin_ref, h0_ref, c0_ref = refs[1 + 3 * num_layers:n_in]
        logits_ref, hn_ref, cn_ref = refs[n_in:n_in + 3]   # outputs
        gates_sc, y_sc, h_sc, c_sc = refs[n_in + 3:]       # VMEM scratch

        B, H = h_sc.shape
        S = x_ref.shape[0] // B

        for l in range(num_layers):
            wih_ref = layer_refs[3 * l + 0]   # (Din, 4H) bf16
            whh_ref = layer_refs[3 * l + 1]   # (H,   4H) bf16
            b_ref = layer_refs[3 * l + 2]     # (1,   4H) f32 (b_ih + b_hh)

            # Hoisted input projection: one big MXU matmul over ALL timesteps.
            src = x_ref[...] if l == 0 else y_sc[...]
            gates_sc[...] = (
                jnp.dot(src.astype(wih_ref.dtype), wih_ref[...],
                        preferred_element_type=jnp.float32)
                + b_ref[...])

            h_sc[...] = h0_ref[l].astype(jnp.float32)
            c_sc[...] = c0_ref[l].astype(jnp.float32)

            # Sequential recurrence: only h @ W_hh + elementwise per step.
            def step(t, carry, whh_ref=whh_ref):
                row = t * B
                g = gates_sc[pl.ds(row, B), :] + jnp.dot(
                    h_sc[...].astype(whh_ref.dtype), whh_ref[...],
                    preferred_element_type=jnp.float32)
                i = jax.nn.sigmoid(g[:, 0 * H:1 * H])
                f = jax.nn.sigmoid(g[:, 1 * H:2 * H])
                gg = jnp.tanh(g[:, 2 * H:3 * H])
                o = jax.nn.sigmoid(g[:, 3 * H:4 * H])
                c = f * c_sc[...] + i * gg
                h = o * jnp.tanh(c)
                c_sc[...] = c
                h_sc[...] = h
                y_sc[pl.ds(row, B), :] = h
                return carry

            lax.fori_loop(0, S, step, 0, unroll=True)

            hn_ref[l] = h_sc[...].astype(hn_ref.dtype)
            cn_ref[l] = c_sc[...].astype(cn_ref.dtype)

        # Final vocab projection, fused here (small V). For large vocab sizes this
        # should become its own tiled pallas_call (parallel grid over (S*B, V) tiles,
        # VMEM-budgeted for v7x's 64 MiB).
        logits_ref[...] = (
            jnp.dot(y_sc[...].astype(wlin_ref.dtype), wlin_ref[...],
                    preferred_element_type=jnp.float32)
            + blin_ref[...]).astype(logits_ref.dtype)

    return kernel


# ------------------------------- PoetryModel ----------------------------------
def init_params(key, vocab_size, embedding_dim, hidden_dim, num_layers,
                weight_dtype=jnp.bfloat16):
    """Weights are stored kernel-ready: pre-transposed, biases pre-summed."""
    keys = jax.random.split(key, 2 + 4 * num_layers)
    params = {
        "embedding": jax.random.normal(
            keys[0], (vocab_size, embedding_dim), jnp.float32) * 0.1,
        "linear_w_t": (jax.random.normal(
            keys[1], (vocab_size, hidden_dim), jnp.float32) * 0.1
        ).T.astype(weight_dtype),                                  # (H, V)
        "linear_b": jnp.zeros((1, vocab_size), jnp.float32),
        "lstm": [],
    }
    for l in range(num_layers):
        din = embedding_dim if l == 0 else hidden_dim
        k = keys[2 + 4 * l: 2 + 4 * (l + 1)]
        w_ih = jax.random.normal(k[0], (4 * hidden_dim, din), jnp.float32) * 0.1
        w_hh = jax.random.normal(k[1], (4 * hidden_dim, hidden_dim), jnp.float32) * 0.1
        b_ih = jax.random.normal(k[2], (4 * hidden_dim,), jnp.float32) * 0.1
        b_hh = jax.random.normal(k[3], (4 * hidden_dim,), jnp.float32) * 0.1
        params["lstm"].append({
            "w_ih_t": w_ih.T.astype(weight_dtype),                 # (Din, 4H)
            "w_hh_t": w_hh.T.astype(weight_dtype),                 # (H,   4H)
            "b": (b_ih + b_hh).reshape(1, 4 * hidden_dim),         # (1,   4H) f32
        })
    return params


@jax.jit
def poetry_model_forward(params, tokens, hidden=None):
    """tokens: (seq_len, batch) int32. Returns (logits (S*B, V), (h_n, c_n))."""
    lstm_params = params["lstm"]
    num_layers = len(lstm_params)
    S, B = tokens.shape
    H = lstm_params[0]["w_hh_t"].shape[0]
    V = params["linear_w_t"].shape[1]

    if hidden is None:
        h_0 = jnp.zeros((num_layers, B, H), jnp.float32)
        c_0 = jnp.zeros((num_layers, B, H), jnp.float32)
    else:
        h_0, c_0 = hidden

    # Embedding gather (parameter gather = glue, plain JAX), flattened time-major.
    x = jnp.take(params["embedding"], tokens.reshape(-1), axis=0)  # (S*B, E)

    inputs = [x]
    for p in lstm_params:
        inputs += [p["w_ih_t"], p["w_hh_t"], p["b"]]
    inputs += [params["linear_w_t"], params["linear_b"], h_0, c_0]

    logits, h_n, c_n = pl.pallas_call(
        _make_poetry_kernel(num_layers),
        out_shape=(
            jax.ShapeDtypeStruct((S * B, V), jnp.float32),
            jax.ShapeDtypeStruct((num_layers, B, H), jnp.float32),
            jax.ShapeDtypeStruct((num_layers, B, H), jnp.float32),
        ),
        scratch_shapes=[
            pltpu.VMEM((S * B, 4 * H), jnp.float32),  # hoisted input-projection gates
            pltpu.VMEM((S * B, H), jnp.float32),      # per-layer sequence output
            pltpu.VMEM((B, H), jnp.float32),          # h carry
            pltpu.VMEM((B, H), jnp.float32),          # c carry
        ],
    )(*inputs)
    return logits, (h_n, c_n)


# ------------------------- pure-JAX f32 reference ------------------------------
def poetry_model_reference(params, tokens, hidden=None):
    S, B = tokens.shape
    lstm_params = params["lstm"]
    L = len(lstm_params)
    H = lstm_params[0]["w_hh_t"].shape[0]
    if hidden is None:
        h_0 = jnp.zeros((L, B, H), jnp.float32)
        c_0 = jnp.zeros((L, B, H), jnp.float32)
    else:
        h_0, c_0 = hidden
    x = jnp.take(params["embedding"], tokens, axis=0)  # (S, B, E)
    h_n, c_n = [], []
    for l in range(L):
        p = lstm_params[l]
        wih = p["w_ih_t"].astype(jnp.float32)
        whh = p["w_hh_t"].astype(jnp.float32)
        b = p["b"]

        def step(carry, xt, wih=wih, whh=whh, b=b):
            h, c = carry
            g = xt @ wih + h @ whh + b
            i = jax.nn.sigmoid(g[:, 0 * H:1 * H])
            f = jax.nn.sigmoid(g[:, 1 * H:2 * H])
            gg = jnp.tanh(g[:, 2 * H:3 * H])
            o = jax.nn.sigmoid(g[:, 3 * H:4 * H])
            c = f * c + i * gg
            h = o * jnp.tanh(c)
            return (h, c), h

        (h_l, c_l), x = lax.scan(step, (h_0[l], c_0[l]), x)
        h_n.append(h_l)
        c_n.append(c_l)
    logits = (x.reshape(S * B, H) @ params["linear_w_t"].astype(jnp.float32)
              + params["linear_b"])
    return logits, (jnp.stack(h_n), jnp.stack(c_n))


if __name__ == "__main__":
    vocab_size = 64
    embedding_dim = 32
    hidden_dim = 32
    seq_len = 8
    batch = 8

    key = jax.random.PRNGKey(0)
    pkey, tkey = jax.random.split(key)
    params = init_params(pkey, vocab_size, embedding_dim, hidden_dim, NUM_LAYERS)
    tokens = jax.random.randint(tkey, (seq_len, batch), 0, vocab_size, jnp.int32)

    logits, (h_n, c_n) = poetry_model_forward(params, tokens)
    jax.block_until_ready((logits, h_n, c_n))

    assert logits.shape == (seq_len * batch, vocab_size)
    assert h_n.shape == (NUM_LAYERS, batch, hidden_dim)
    assert c_n.shape == (NUM_LAYERS, batch, hidden_dim)

    # Loose numerical check vs. pure-JAX f32 reference (kernel matmuls run in bf16).
    ref_logits, (ref_h, ref_c) = poetry_model_reference(params, tokens)
    max_err = max(float(jnp.max(jnp.abs(logits - ref_logits))),
                  float(jnp.max(jnp.abs(h_n - ref_h))),
                  float(jnp.max(jnp.abs(c_n - ref_c))))
    assert max_err < 2e-2, f"max abs error {max_err}"

    print("KERNEL_OK")
</pallas_src>

<mosaic_0001>
module attributes {stable_mosaic.version = 11 : i64} {
  func.func @kernel(%arg0: memref<64x32xf32, #tpu.memory_space<vmem>>, %arg1: memref<32x128xbf16, #tpu.memory_space<vmem>>, %arg2: memref<32x128xbf16, #tpu.memory_space<vmem>>, %arg3: memref<1x128xf32, #tpu.memory_space<vmem>>, %arg4: memref<32x128xbf16, #tpu.memory_space<vmem>>, %arg5: memref<32x128xbf16, #tpu.memory_space<vmem>>, %arg6: memref<1x128xf32, #tpu.memory_space<vmem>>, %arg7: memref<32x64xbf16, #tpu.memory_space<vmem>>, %arg8: memref<1x64xf32, #tpu.memory_space<vmem>>, %arg9: memref<2x8x32xf32, #tpu.memory_space<vmem>>, %arg10: memref<2x8x32xf32, #tpu.memory_space<vmem>>, %arg11: memref<64x64xf32, #tpu.memory_space<vmem>>, %arg12: memref<2x8x32xf32, #tpu.memory_space<vmem>>, %arg13: memref<2x8x32xf32, #tpu.memory_space<vmem>>, %arg14: memref<64x128xf32, #tpu.memory_space<vmem>>, %arg15: memref<64x32xf32, #tpu.memory_space<vmem>>, %arg16: memref<8x32xf32, #tpu.memory_space<vmem>>, %arg17: memref<8x32xf32, #tpu.memory_space<vmem>>) attributes {dimension_semantics = [], scalar_prefetch = 0 : i64, scratch_operands = 4 : i64, tpu.core_type = #tpu.core_type<tc>} {
    %c0 = arith.constant 0 : index
    %c0_0 = arith.constant 0 : index
    %0 = vector.load %arg0[%c0, %c0_0] : memref<64x32xf32, #tpu.memory_space<vmem>>, vector<64x32xf32>
    %1 = arith.truncf %0 : vector<64x32xf32> to vector<64x32xbf16>
    %c0_1 = arith.constant 0 : index
    %c0_2 = arith.constant 0 : index
    %2 = vector.load %arg1[%c0_1, %c0_2] : memref<32x128xbf16, #tpu.memory_space<vmem>>, vector<32x128xbf16>
    %cst = arith.constant dense<0.000000e+00> : vector<64x128xf32>
    %3 = tpu.matmul %1, %2, %cst {dimension_numbers = #tpu.dot_dimension_numbers<[1], [0], [0], [1], [0, 0, 1, 1], [], []>} : vector<64x32xbf16>, vector<32x128xbf16>, vector<64x128xf32> -> vector<64x128xf32>
    %c0_3 = arith.constant 0 : index
    %c0_4 = arith.constant 0 : index
    %4 = vector.load %arg3[%c0_3, %c0_4] : memref<1x128xf32, #tpu.memory_space<vmem>>, vector<1x128xf32>
    %5 = vector.broadcast %4 : vector<1x128xf32> to vector<64x128xf32>
    %6 = arith.addf %3, %5 : vector<64x128xf32>
    %c0_5 = arith.constant 0 : index
    %c0_6 = arith.constant 0 : index
    %7 = vector.load %arg14[%c0_5, %c0_6] : memref<64x128xf32, #tpu.memory_space<vmem>>, vector<64x128xf32>
    tpu.vector_store %arg14[%c0_5, %c0_6], %6 {strides = array<i32>} : memref<64x128xf32, #tpu.memory_space<vmem>>, vector<64x128xf32>,
    %c0_7 = arith.constant 0 : index
    %c0_8 = arith.constant 0 : index
    %c0_9 = arith.constant 0 : index
    %8 = vector.load %arg9[%c0_7, %c0_8, %c0_9] : memref<2x8x32xf32, #tpu.memory_space<vmem>>, vector<1x8x32xf32>
    %9 = vector.shape_cast %8 : vector<1x8x32xf32> to vector<8x32xf32>
    %c0_10 = arith.constant 0 : index
    %c0_11 = arith.constant 0 : index
    %10 = vector.load %arg16[%c0_10, %c0_11] : memref<8x32xf32, #tpu.memory_space<vmem>>, vector<8x32xf32>
    tpu.vector_store %arg16[%c0_10, %c0_11], %9 {strides = array<i32>} : memref<8x32xf32, #tpu.memory_space<vmem>>, vector<8x32xf32>,
    %c0_12 = arith.constant 0 : index
    %c0_13 = arith.constant 0 : index
    %c0_14 = arith.constant 0 : index
    %11 = vector.load %arg10[%c0_12, %c0_13, %c0_14] : memref<2x8x32xf32, #tpu.memory_space<vmem>>, vector<1x8x32xf32>
    %12 = vector.shape_cast %11 : vector<1x8x32xf32> to vector<8x32xf32>
    %c0_15 = arith.constant 0 : index
    %c0_16 = arith.constant 0 : index
    %13 = vector.load %arg17[%c0_15, %c0_16] : memref<8x32xf32, #tpu.memory_space<vmem>>, vector<8x32xf32>
    tpu.vector_store %arg17[%c0_15, %c0_16], %12 {strides = array<i32>} : memref<8x32xf32, #tpu.memory_space<vmem>>, vector<8x32xf32>,
    %c0_i32 = arith.constant 0 : i32
    %c8_i32 = arith.constant 8 : i32
    %14 = arith.muli %c0_i32, %c8_i32 : i32
    %15 = arith.index_cast %14 : i32 to index
    %c0_17 = arith.constant 0 : index
    %16 = vector.load %arg14[%15, %c0_17] : memref<64x128xf32, #tpu.memory_space<vmem>>, vector<8x128xf32>
    %c0_18 = arith.constant 0 : index
    %c0_19 = arith.constant 0 : index
    %17 = vector.load %arg16[%c0_18, %c0_19] : memref<8x32xf32, #tpu.memory_space<vmem>>, vector<8x32xf32>
    %18 = arith.truncf %17 : vector<8x32xf32> to vector<8x32xbf16>
    %c0_20 = arith.constant 0 : index
    %c0_21 = arith.constant 0 : index
    %19 = vector.load %arg2[%c0_20, %c0_21] : memref<32x128xbf16, #tpu.memory_space<vmem>>, vector<32x128xbf16>
    %cst_22 = arith.constant dense<0.000000e+00> : vector<8x128xf32>
    %20 = tpu.matmul %18, %19, %cst_22 {dimension_numbers = #tpu.dot_dimension_numbers<[1], [0], [0], [1], [0, 0, 1, 1], [], []>} : vector<8x32xbf16>, vector<32x128xbf16>, vector<8x128xf32> -> vector<8x128xf32>
    %21 = arith.addf %16, %20 : vector<8x128xf32>
    %22 = vector.extract_strided_slice %21 {offsets = [0, 0], sizes = [8, 32], strides = [1, 1]} : vector<8x128xf32> to vector<8x32xf32>
    %23 = arith.negf %22 : vector<8x32xf32>
    %24 = math.exp %23 : vector<8x32xf32>
    %cst_23 = arith.constant 1.000000e+00 : f32
    %25 = vector.broadcast %cst_23 : f32 to vector<8x32xf32>
    %26 = arith.addf %25, %24 : vector<8x32xf32>
    %27 = arith.divf %25, %26 : vector<8x32xf32>
    %28 = vector.extract_strided_slice %21 {offsets = [0, 32], sizes = [8, 32], strides = [1, 1]} : vector<8x128xf32> to vector<8x32xf32>
    %29 = arith.negf %28 : vector<8x32xf32>
    %30 = math.exp %29 : vector<8x32xf32>
    %cst_24 = arith.constant 1.000000e+00 : f32
    %31 = vector.broadcast %cst_24 : f32 to vector<8x32xf32>
    %32 = arith.addf %31, %30 : vector<8x32xf32>
    %33 = arith.divf %31, %32 : vector<8x32xf32>
    %34 = vector.extract_strided_slice %21 {offsets = [0, 64], sizes = [8, 32], strides = [1, 1]} : vector<8x128xf32> to vector<8x32xf32>
    %35 = math.tanh %34 : vector<8x32xf32>
    %36 = vector.extract_strided_slice %21 {offsets = [0, 96], sizes = [8, 32], strides = [1, 1]} : vector<8x128xf32> to vector<8x32xf32>
    %37 = arith.negf %36 : vector<8x32xf32>
    %38 = math.exp %37 : vector<8x32xf32>
    %cst_25 = arith.constant 1.000000e+00 : f32
    %39 = vector.broadcast %cst_25 : f32 to vector<8x32xf32>
    %40 = arith.addf %39, %38 : vector<8x32xf32>
    %41 = arith.divf %39, %40 : vector<8x32xf32>
    %c0_26 = arith.constant 0 : index
    %c0_27 = arith.constant 0 : index
    %42 = vector.load %arg17[%c0_26, %c0_27] : memref<8x32xf32, #tpu.memory_space<vmem>>, vector<8x32xf32>
    %43 = arith.mulf %33, %42 : vector<8x32xf32>
    %44 = arith.mulf %27, %35 : vector<8x32xf32>
    %45 = arith.addf %43, %44 : vector<8x32xf32>
    %46 = math.tanh %45 : vector<8x32xf32>
    %47 = arith.mulf %41, %46 : vector<8x32xf32>
    %c0_28 = arith.constant 0 : index
    %c0_29 = arith.constant 0 : index
    %48 = vector.load %arg17[%c0_28, %c0_29] : memref<8x32xf32, #tpu.memory_space<vmem>>, vector<8x32xf32>
    tpu.vector_store %arg17[%c0_28, %c0_29], %45 {strides = array<i32>} : memref<8x32xf32, #tpu.memory_space<vmem>>, vector<8x32xf32>,
    %c0_30 = arith.constant 0 : index
    %c0_31 = arith.constant 0 : index
    %49 = vector.load %arg16[%c0_30, %c0_31] : memref<8x32xf32, #tpu.memory_space<vmem>>, vector<8x32xf32>
    tpu.vector_store %arg16[%c0_30, %c0_31], %47 {strides = array<i32>} : memref<8x32xf32, #tpu.memory_space<vmem>>, vector<8x32xf32>,
    %50 = arith.index_cast %14 : i32 to index
    %c0_32 = arith.constant 0 : index
    %51 = vector.load %arg15[%50, %c0_32] : memref<64x32xf32, #tpu.memory_space<vmem>>, vector<8x32xf32>
    tpu.vector_store %arg15[%50, %c0_32], %47 {strides = array<i32>} : memref<64x32xf32, #tpu.memory_space<vmem>>, vector<8x32xf32>,
    %c1_i32 = arith.constant 1 : i32
    %c8_i32_33 = arith.constant 8 : i32
    %52 = arith.muli %c1_i32, %c8_i32_33 : i32
    %53 = arith.index_cast %52 : i32 to index
    %c0_34 = arith.constant 0 : index
    %54 = vector.load %arg14[%53, %c0_34] : memref<64x128xf32, #tpu.memory_space<vmem>>, vector<8x128xf32>
    %c0_35 = arith.constant 0 : index
    %c0_36 = arith.constant 0 : index
    %55 = vector.load %arg16[%c0_35, %c0_36] : memref<8x32xf32, #tpu.memory_space<vmem>>, vector<8x32xf32>
    %56 = arith.truncf %55 : vector<8x32xf32> to vector<8x32xbf16>
    %c0_37 = arith.constant 0 : index
    %c0_38 = arith.constant 0 : index
    %57 = vector.load %arg2[%c0_37, %c0_38] : memref<32x128xbf16, #tpu.memory_space<vmem>>, vector<32x128xbf16>
    %cst_39 = arith.constant dense<0.000000e+00> : vector<8x128xf32>
    %58 = tpu.matmul %56, %57, %cst_39 {dimension_numbers = #tpu.dot_dimension_numbers<[1], [0], [0], [1], [0, 0, 1, 1], [], []>} : vector<8x32xbf16>, vector<32x128xbf16>, vector<8x128xf32> -> vector<8x128xf32>
    %59 = arith.addf %54, %58 : vector<8x128xf32>
    %60 = vector.extract_strided_slice %59 {offsets = [0, 0], sizes = [8, 32], strides = [1, 1]} : vector<8x128xf32> to vector<8x32xf32>
    %61 = arith.negf %60 : vector<8x32xf32>
    %62 = math.exp %61 : vector<8x32xf32>
    %cst_40 = arith.constant 1.000000e+00 : f32
    %63 = vector.broadcast %cst_40 : f32 to vector<8x32xf32>
    %64 = arith.addf %63, %62 : vector<8x32xf32>
    %65 = arith.divf %63, %64 : vector<8x32xf32>
    %66 = vector.extract_strided_slice %59 {offsets = [0, 32], sizes = [8, 32], strides = [1, 1]} : vector<8x128xf32> to vector<8x32xf32>
    %67 = arith.negf %66 : vector<8x32xf32>
    %68 = math.exp %67 : vector<8x32xf32>
    %cst_41 = arith.constant 1.000000e+00 : f32
    %69 = vector.broadcast %cst_41 : f32 to vector<8x32xf32>
    %70 = arith.addf %69, %68 : vector<8x32xf32>
    %71 = arith.divf %69, %70 : vector<8x32xf32>
    %72 = vector.extract_strided_slice %59 {offsets = [0, 64], sizes = [8, 32], strides = [1, 1]} : vector<8x128xf32> to vector<8x32xf32>
    %73 = math.tanh %72 : vector<8x32xf32>
    %74 = vector.extract_strided_slice %59 {offsets = [0, 96], sizes = [8, 32], strides = [1, 1]} : vector<8x128xf32> to vector<8x32xf32>
    %75 = arith.negf %74 : vector<8x32xf32>
    %76 = math.exp %75 : vector<8x32xf32>
    %cst_42 = arith.constant 1.000000e+00 : f32
    %77 = vector.broadcast %cst_42 : f32 to vector<8x32xf32>
    %78 = arith.addf %77, %76 : vector<8x32xf32>
    %79 = arith.divf %77, %78 : vector<8x32xf32>
    %c0_43 = arith.constant 0 : index
    %c0_44 = arith.constant 0 : index
    %80 = vector.load %arg17[%c0_43, %c0_44] : memref<8x32xf32, #tpu.memory_space<vmem>>, vector<8x32xf32>
    %81 = arith.mulf %71, %80 : vector<8x32xf32>
    %82 = arith.mulf %65, %73 : vector<8x32xf32>
    %83 = arith.addf %81, %82 : vector<8x32xf32>
    %84 = math.tanh %83 : vector<8x32xf32>
    %85 = arith.mulf %79, %84 : vector<8x32xf32>
    %c0_45 = arith.constant 0 : index
    %c0_46 = arith.constant 0 : index
    %86 = vector.load %arg17[%c0_45, %c0_46] : memref<8x32xf32, #tpu.memory_space<vmem>>, vector<8x32xf32>
    tpu.vector_store %arg17[%c0_45, %c0_46], %83 {strides = array<i32>} : memref<8x32xf32, #tpu.memory_space<vmem>>, vector<8x32xf32>,
    %c0_47 = arith.constant 0 : index
    %c0_48 = arith.constant 0 : index
    %87 = vector.load %arg16[%c0_47, %c0_48] : memref<8x32xf32, #tpu.memory_space<vmem>>, vector<8x32xf32>
    tpu.vector_store %arg16[%c0_47, %c0_48], %85 {strides = array<i32>} : memref<8x32xf32, #tpu.memory_space<vmem>>, vector<8x32xf32>,
    %88 = arith.index_cast %52 : i32 to index
    %c0_49 = arith.constant 0 : index
    %89 = vector.load %arg15[%88, %c0_49] : memref<64x32xf32, #tpu.memory_space<vmem>>, vector<8x32xf32>
    tpu.vector_store %arg15[%88, %c0_49], %85 {strides = array<i32>} : memref<64x32xf32, #tpu.memory_space<vmem>>, vector<8x32xf32>,
    %c2_i32 = arith.constant 2 : i32
    %c8_i32_50 = arith.constant 8 : i32
    %90 = arith.muli %c2_i32, %c8_i32_50 : i32
    %91 = arith.index_cast %90 : i32 to index
    %c0_51 = arith.constant 0 : index
    %92 = vector.load %arg14[%91, %c0_51] : memref<64x128xf32, #tpu.memory_space<vmem>>, vector<8x128xf32>
    %c0_52 = arith.constant 0 : index
    %c0_53 = arith.constant 0 : index
    %93 = vector.load %arg16[%c0_52, %c0_53] : memref<8x32xf32, #tpu.memory_space<vmem>>, vector<8x32xf32>
    %94 = arith.truncf %93 : vector<8x32xf32> to vector<8x32xbf16>
    %c0_54 = arith.constant 0 : index
    %c0_55 = arith.constant 0 : index
    %95 = vector.load %arg2[%c0_54, %c0_55] : memref<32x128xbf16, #tpu.memory_space<vmem>>, vector<32x128xbf16>
    %cst_56 = arith.constant dense<0.000000e+00> : vector<8x128xf32>
    %96 = tpu.matmul %94, %95, %cst_56 {dimension_numbers = #tpu.dot_dimension_numbers<[1], [0], [0], [1], [0, 0, 1, 1], [], []>} : vector<8x32xbf16>, vector<32x128xbf16>, vector<8x128xf32> -> vector<8x128xf32>
    %97 = arith.addf %92, %96 : vector<8x128xf32>
    %98 = vector.extract_strided_slice %97 {offsets = [0, 0], sizes = [8, 32], strides = [1, 1]} : vector<8x128xf32> to vector<8x32xf32>
    %99 = arith.negf %98 : vector<8x32xf32>
    %100 = math.exp %99 : vector<8x32xf32>
    %cst_57 = arith.constant 1.000000e+00 : f32
    %101 = vector.broadcast %cst_57 : f32 to vector<8x32xf32>
    %102 = arith.addf %101, %100 : vector<8x32xf32>
    %103 = arith.divf %101, %102 : vector<8x32xf32>
    %104 = vector.extract_strided_slice %97 {offsets = [0, 32], sizes = [8, 32], strides = [1, 1]} : vector<8x128xf32> to vector<8x32xf32>
    %105 = arith.negf %104 : vector<8x32xf32>
    %106 = math.exp %105 : vector<8x32xf32>
    %cst_58 = arith.constant 1.000000e+00 : f32
    %107 = vector.broadcast %cst_58 : f32 to vector<8x32xf32>
    %108 = arith.addf %107, %106 : vector<8x32xf32>
    %109 = arith.divf %107, %108 : vector<8x32xf32>
    %110 = vector.extract_strided_slice %97 {offsets = [0, 64], sizes = [8, 32], strides = [1, 1]} : vector<8x128xf32> to vector<8x32xf32>
    %111 = math.tanh %110 : vector<8x32xf32>
    %112 = vector.extract_strided_slice %97 {offsets = [0, 96], sizes = [8, 32], strides = [1, 1]} : vector<8x128xf32> to vector<8x32xf32>
    %113 = arith.negf %112 : vector<8x32xf32>
    %114 = math.exp %113 : vector<8x32xf32>
    %cst_59 = arith.constant 1.000000e+00 : f32
    %115 = vector.broadcast %cst_59 : f32 to vector<8x32xf32>
    %116 = arith.addf %115, %114 : vector<8x32xf32>
    %117 = arith.divf %115, %116 : vector<8x32xf32>
    %c0_60 = arith.constant 0 : index
    %c0_61 = arith.constant 0 : index
    %118 = vector.load %arg17[%c0_60, %c0_61] : memref<8x32xf32, #tpu.memory_space<vmem>>, vector<8x32xf32>
    %119 = arith.mulf %109, %118 : vector<8x32xf32>
    %120 = arith.mulf %103, %111 : vector<8x32xf32>
    %121 = arith.addf %119, %120 : vector<8x32xf32>
    %122 = math.tanh %121 : vector<8x32xf32>
    %123 = arith.mulf %117, %122 : vector<8x32xf32>
    %c0_62 = arith.constant 0 : index
    %c0_63 = arith.constant 0 : index
    %124 = vector.load %arg17[%c0_62, %c0_63] : memref<8x32xf32, #tpu.memory_space<vmem>>, vector<8x32xf32>
    tpu.vector_store %arg17[%c0_62, %c0_63], %121 {strides = array<i32>} : memref<8x32xf32, #tpu.memory_space<vmem>>, vector<8x32xf32>,
    %c0_64 = arith.constant 0 : index
    %c0_65 = arith.constant 0 : index
    %125 = vector.load %arg16[%c0_64, %c0_65] : memref<8x32xf32, #tpu.memory_space<vmem>>, vector<8x32xf32>
    tpu.vector_store %arg16[%c0_64, %c0_65], %123 {strides = array<i32>} : memref<8x32xf32, #tpu.memory_space<vmem>>, vector<8x32xf32>,
    %126 = arith.index_cast %90 : i32 to index
    %c0_66 = arith.constant 0 : index
    %127 = vector.load %arg15[%126, %c0_66] : memref<64x32xf32, #tpu.memory_space<vmem>>, vector<8x32xf32>
    tpu.vector_store %arg15[%126, %c0_66], %123 {strides = array<i32>} : memref<64x32xf32, #tpu.memory_space<vmem>>, vector<8x32xf32>,
    %c3_i32 = arith.constant 3 : i32
    %c8_i32_67 = arith.constant 8 : i32
    %128 = arith.muli %c3_i32, %c8_i32_67 : i32
    %129 = arith.index_cast %128 : i32 to index
    %c0_68 = arith.constant 0 : index
    %130 = vector.load %arg14[%129, %c0_68] : memref<64x128xf32, #tpu.memory_space<vmem>>, vector<8x128xf32>
    %c0_69 = arith.constant 0 : index
    %c0_70 = arith.constant 0 : index
    %131 = vector.load %arg16[%c0_69, %c0_70] : memref<8x32xf32, #tpu.memory_space<vmem>>, vector<8x32xf32>
    %132 = arith.truncf %131 : vector<8x32xf32> to vector<8x32xbf16>
    %c0_71 = arith.constant 0 : index
    %c0_72 = arith.constant 0 : index
    %133 = vector.load %arg2[%c0_71, %c0_72] : memref<32x128xbf16, #tpu.memory_space<vmem>>, vector<32x128xbf16>
    %cst_73 = arith.constant dense<0.000000e+00> : vector<8x128xf32>
    %134 = tpu.matmul %132, %133, %cst_73 {dimension_numbers = #tpu.dot_dimension_numbers<[1], [0], [0], [1], [0, 0, 1, 1], [], []>} : vector<8x32xbf16>, vector<32x128xbf16>, vector<8x128xf32> -> vector<8x128xf32>
    %135 = arith.addf %130, %134 : vector<8x128xf32>
    %136 = vector.extract_strided_slice %135 {offsets = [0, 0], sizes = [8, 32], strides = [1, 1]} : vector<8x128xf32> to vector<8x32xf32>
    %137 = arith.negf %136 : vector<8x32xf32>
    %138 = math.exp %137 : vector<8x32xf32>
    %cst_74 = arith.constant 1.000000e+00 : f32
    %139 = vector.broadcast %cst_74 : f32 to vector<8x32xf32>
    %140 = arith.addf %139, %138 : vector<8x32xf32>
    %141 = arith.divf %139, %140 : vector<8x32xf32>
    %142 = vector.extract_strided_slice %135 {offsets = [0, 32], sizes = [8, 32], strides = [1, 1]} : vector<8x128xf32> to vector<8x32xf32>
    %143 = arith.negf %142 : vector<8x32xf32>
    %144 = math.exp %143 : vector<8x32xf32>
    %cst_75 = arith.constant 1.000000e+00 : f32
    %145 = vector.broadcast %cst_75 : f32 to vector<8x32xf32>
    %146 = arith.addf %145, %144 : vector<8x32xf32>
    %147 = arith.divf %145, %146 : vector<8x32xf32>
    %148 = vector.extract_strided_slice %135 {offsets = [0, 64], sizes = [8, 32], strides = [1, 1]} : vector<8x128xf32> to vector<8x32xf32>
    %149 = math.tanh %148 : vector<8x32xf32>
    %150 = vector.extract_strided_slice %135 {offsets = [0, 96], sizes = [8, 32], strides = [1, 1]} : vector<8x128xf32> to vector<8x32xf32>
    %151 = arith.negf %150 : vector<8x32xf32>
    %152 = math.exp %151 : vector<8x32xf32>
    %cst_76 = arith.constant 1.000000e+00 : f32
    %153 = vector.broadcast %cst_76 : f32 to vector<8x32xf32>
    %154 = arith.addf %153, %152 : vector<8x32xf32>
    %155 = arith.divf %153, %154 : vector<8x32xf32>
    %c0_77 = arith.constant 0 : index
    %c0_78 = arith.constant 0 : index
    %156 = vector.load %arg17[%c0_77, %c0_78] : memref<8x32xf32, #tpu.memory_space<vmem>>, vector<8x32xf32>
    %157 = arith.mulf %147, %156 : vector<8x32xf32>
    %158 = arith.mulf %141, %149 : vector<8x32xf32>
    %159 = arith.addf %157, %158 : vector<8x32xf32>
    %160 = math.tanh %159 : vector<8x32xf32>
    %161 = arith.mulf %155, %160 : vector<8x32xf32>
    %c0_79 = arith.constant 0 : index
    %c0_80 = arith.constant 0 : index
    %162 = vector.load %arg17[%c0_79, %c0_80] : memref<8x32xf32, #tpu.memory_space<vmem>>, vector<8x32xf32>
    tpu.vector_store %arg17[%c0_79, %c0_80], %159 {strides = array<i32>} : memref<8x32xf32, #tpu.memory_space<vmem>>, vector<8x32xf32>,
    %c0_81 = arith.constant 0 : index
    %c0_82 = arith.constant 0 : index
    %163 = vector.load %arg16[%c0_81, %c0_82] : memref<8x32xf32, #tpu.memory_space<vmem>>, vector<8x32xf32>
    tpu.vector_store %arg16[%c0_81, %c0_82], %161 {strides = array<i32>} : memref<8x32xf32, #tpu.memory_space<vmem>>, vector<8x32xf32>,
    %164 = arith.index_cast %128 : i32 to index
    %c0_83 = arith.constant 0 : index
    %165 = vector.load %arg15[%164, %c0_83] : memref<64x32xf32, #tpu.memory_space<vmem>>, vector<8x32xf32>
    tpu.vector_store %arg15[%164, %c0_83], %161 {strides = array<i32>} : memref<64x32xf32, #tpu.memory_space<vmem>>, vector<8x32xf32>,
    %c4_i32 = arith.constant 4 : i32
    %c8_i32_84 = arith.constant 8 : i32
    %166 = arith.muli %c4_i32, %c8_i32_84 : i32
    %167 = arith.index_cast %166 : i32 to index
    %c0_85 = arith.constant 0 : index
    %168 = vector.load %arg14[%167, %c0_85] : memref<64x128xf32, #tpu.memory_space<vmem>>, vector<8x128xf32>
    %c0_86 = arith.constant 0 : index
    %c0_87 = arith.constant 0 : index
    %169 = vector.load %arg16[%c0_86, %c0_87] : memref<8x32xf32, #tpu.memory_space<vmem>>, vector<8x32xf32>
    %170 = arith.truncf %169 : vector<8x32xf32> to vector<8x32xbf16>
    %c0_88 = arith.constant 0 : index
    %c0_89 = arith.constant 0 : index
    %171 = vector.load %arg2[%c0_88, %c0_89] : memref<32x128xbf16, #tpu.memory_space<vmem>>, vector<32x128xbf16>
    %cst_90 = arith.constant dense<0.000000e+00> : vector<8x128xf32>
    %172 = tpu.matmul %170, %171, %cst_90 {dimension_numbers = #tpu.dot_dimension_numbers<[1], [0], [0], [1], [0, 0, 1, 1], [], []>} : vector<8x32xbf16>, vector<32x128xbf16>, vector<8x128xf32> -> vector<8x128xf32>
    %173 = arith.addf %168, %172 : vector<8x128xf32>
    %174 = vector.extract_strided_slice %173 {offsets = [0, 0], sizes = [8, 32], strides = [1, 1]} : vector<8x128xf32> to vector<8x32xf32>
    %175 = arith.negf %174 : vector<8x32xf32>
    %176 = math.exp %175 : vector<8x32xf32>
    %cst_91 = arith.constant 1.000000e+00 : f32
    %177 = vector.broadcast %cst_91 : f32 to vector<8x32xf32>
    %178 = arith.addf %177, %176 : vector<8x32xf32>
    %179 = arith.divf %177, %178 : vector<8x32xf32>
    %180 = vector.extract_strided_slice %173 {offsets = [0, 32], sizes = [8, 32], strides = [1, 1]} : vector<8x128xf32> to vector<8x32xf32>
    %181 = arith.negf %180 : vector<8x32xf32>
    %182 = math.exp %181 : vector<8x32xf32>
    %cst_92 = arith.constant 1.000000e+00 : f32
    %183 = vector.broadcast %cst_92 : f32 to vector<8x32xf32>
    %184 = arith.addf %183, %182 : vector<8x32xf32>
    %185 = arith.divf %183, %184 : vector<8x32xf32>
    %186 = vector.extract_strided_slice %173 {offsets = [0, 64], sizes = [8, 32], strides = [1, 1]} : vector<8x128xf32> to vector<8x32xf32>
    %187 = math.tanh %186 : vector<8x32xf32>
    %188 = vector.extract_strided_slice %173 {offsets = [0, 96], sizes = [8, 32], strides = [1, 1]} : vector<8x128xf32> to vector<8x32xf32>
    %189 = arith.negf %188 : vector<8x32xf32>
    %190 = math.exp %189 : vector<8x32xf32>
    %cst_93 = arith.constant 1.000000e+00 : f32
    %191 = vector.broadcast %cst_93 : f32 to vector<8x32xf32>
    %192 = arith.addf %191, %190 : vector<8x32xf32>
    %193 = arith.divf %191, %192 : vector<8x32xf32>
    %c0_94 = arith.constant 0 : index
    %c0_95 = arith.constant 0 : index
    %194 = vector.load %arg17[%c0_94, %c0_95] : memref<8x32xf32, #tpu.memory_space<vmem>>, vector<8x32xf32>
    %195 = arith.mulf %185, %194 : vector<8x32xf32>
    %196 = arith.mulf %179, %187 : vector<8x32xf32>
    %197 = arith.addf %195, %196 : vector<8x32xf32>
    %198 = math.tanh %197 : vector<8x32xf32>
    %199 = arith.mulf %193, %198 : vector<8x32xf32>
    %c0_96 = arith.constant 0 : index
    %c0_97 = arith.constant 0 : index
    %200 = vector.load %arg17[%c0_96, %c0_97] : memref<8x32xf32, #tpu.memory_space<vmem>>, vector<8x32xf32>
    tpu.vector_store %arg17[%c0_96, %c0_97], %197 {strides = array<i32>} : memref<8x32xf32, #tpu.memory_space<vmem>>, vector<8x32xf32>,
    %c0_98 = arith.constant 0 : index
    %c0_99 = arith.constant 0 : index
    %201 = vector.load %arg16[%c0_98, %c0_99] : memref<8x32xf32, #tpu.memory_space<vmem>>, vector<8x32xf32>
    tpu.vector_store %arg16[%c0_98, %c0_99], %199 {strides = array<i32>} : memref<8x32xf32, #tpu.memory_space<vmem>>, vector<8x32xf32>,
    %202 = arith.index_cast %166 : i32 to index
    %c0_100 = arith.constant 0 : index
    %203 = vector.load %arg15[%202, %c0_100] : memref<64x32xf32, #tpu.memory_space<vmem>>, vector<8x32xf32>
    tpu.vector_store %arg15[%202, %c0_100], %199 {strides = array<i32>} : memref<64x32xf32, #tpu.memory_space<vmem>>, vector<8x32xf32>,
    %c5_i32 = arith.constant 5 : i32
    %c8_i32_101 = arith.constant 8 : i32
    %204 = arith.muli %c5_i32, %c8_i32_101 : i32
    %205 = arith.index_cast %204 : i32 to index
    %c0_102 = arith.constant 0 : index
    %206 = vector.load %arg14[%205, %c0_102] : memref<64x128xf32, #tpu.memory_space<vmem>>, vector<8x128xf32>
    %c0_103 = arith.constant 0 : index
    %c0_104 = arith.constant 0 : index
    %207 = vector.load %arg16[%c0_103, %c0_104] : memref<8x32xf32, #tpu.memory_space<vmem>>, vector<8x32xf32>
    %208 = arith.truncf %207 : vector<8x32xf32> to vector<8x32xbf16>
    %c0_105 = arith.constant 0 : index
    %c0_106 = arith.constant 0 : index
    %209 = vector.load %arg2[%c0_105, %c0_106] : memref<32x128xbf16, #tpu.memory_space<vmem>>, vector<32x128xbf16>
    %cst_107 = arith.constant dense<0.000000e+00> : vector<8x128xf32>
    %210 = tpu.matmul %208, %209, %cst_107 {dimension_numbers = #tpu.dot_dimension_numbers<[1], [0], [0], [1], [0, 0, 1, 1], [], []>} : vector<8x32xbf16>, vector<32x128xbf16>, vector<8x128xf32> -> vector<8x128xf32>
    %211 = arith.addf %206, %210 : vector<8x128xf32>
    %212 = vector.extract_strided_slice %211 {offsets = [0, 0], sizes = [8, 32], strides = [1, 1]} : vector<8x128xf32> to vector<8x32xf32>
    %213 = arith.negf %212 : vector<8x32xf32>
    %214 = math.exp %213 : vector<8x32xf32>
    %cst_108 = arith.constant 1.000000e+00 : f32
    %215 = vector.broadcast %cst_108 : f32 to vector<8x32xf32>
    %216 = arith.addf %215, %214 : vector<8x32xf32>
    %217 = arith.divf %215, %216 : vector<8x32xf32>
    %218 = vector.extract_strided_slice %211 {offsets = [0, 32], sizes = [8, 32], strides = [1, 1]} : vector<8x128xf32> to vector<8x32xf32>
    %219 = arith.negf %218 : vector<8x32xf32>
    %220 = math.exp %219 : vector<8x32xf32>
    %cst_109 = arith.constant 1.000000e+00 : f32
    %221 = vector.broadcast %cst_109 : f32 to vector<8x32xf32>
    %222 = arith.addf %221, %220 : vector<8x32xf32>
    %223 = arith.divf %221, %222 : vector<8x32xf32>
    %224 = vector.extract_strided_slice %211 {offsets = [0, 64], sizes = [8, 32], strides = [1, 1]} : vector<8x128xf32> to vector<8x32xf32>
    %225 = math.tanh %224 : vector<8x32xf32>
    %226 = vector.extract_strided_slice %211 {offsets = [0, 96], sizes = [8, 32], strides = [1, 1]} : vector<8x128xf32> to vector<8x32xf32>
    %227 = arith.negf %226 : vector<8x32xf32>
    %228 = math.exp %227 : vector<8x32xf32>
    %cst_110 = arith.constant 1.000000e+00 : f32
    %229 = vector.broadcast %cst_110 : f32 to vector<8x32xf32>
    %230 = arith.addf %229, %228 : vector<8x32xf32>
    %231 = arith.divf %229, %230 : vector<8x32xf32>
    %c0_111 = arith.constant 0 : index
    %c0_112 = arith.constant 0 : index
    %232 = vector.load %arg17[%c0_111, %c0_112] : memref<8x32xf32, #tpu.memory_space<vmem>>, vector<8x32xf32>
    %233 = arith.mulf %223, %232 : vector<8x32xf32>
    %234 = arith.mulf %217, %225 : vector<8x32xf32>
    %235 = arith.addf %233, %234 : vector<8x32xf32>
    %236 = math.tanh %235 : vector<8x32xf32>
    %237 = arith.mulf %231, %236 : vector<8x32xf32>
    %c0_113 = arith.constant 0 : index
    %c0_114 = arith.constant 0 : index
    %238 = vector.load %arg17[%c0_113, %c0_114] : memref<8x32xf32, #tpu.memory_space<vmem>>, vector<8x32xf32>
    tpu.vector_store %arg17[%c0_113, %c0_114], %235 {strides = array<i32>} : memref<8x32xf32, #tpu.memory_space<vmem>>, vector<8x32xf32>,
    %c0_115 = arith.constant 0 : index
    %c0_116 = arith.constant 0 : index
    %239 = vector.load %arg16[%c0_115, %c0_116] : memref<8x32xf32, #tpu.memory_space<vmem>>, vector<8x32xf32>
    tpu.vector_store %arg16[%c0_115, %c0_116], %237 {strides = array<i32>} : memref<8x32xf32, #tpu.memory_space<vmem>>, vector<8x32xf32>,
    %240 = arith.index_cast %204 : i32 to index
    %c0_117 = arith.constant 0 : index
    %241 = vector.load %arg15[%240, %c0_117] : memref<64x32xf32, #tpu.memory_space<vmem>>, vector<8x32xf32>
    tpu.vector_store %arg15[%240, %c0_117], %237 {strides = array<i32>} : memref<64x32xf32, #tpu.memory_space<vmem>>, vector<8x32xf32>,
    %c6_i32 = arith.constant 6 : i32
    %c8_i32_118 = arith.constant 8 : i32
    %242 = arith.muli %c6_i32, %c8_i32_118 : i32
    %243 = arith.index_cast %242 : i32 to index
    %c0_119 = arith.constant 0 : index
    %244 = vector.load %arg14[%243, %c0_119] : memref<64x128xf32, #tpu.memory_space<vmem>>, vector<8x128xf32>
    %c0_120 = arith.constant 0 : index
    %c0_121 = arith.constant 0 : index
    %245 = vector.load %arg16[%c0_120, %c0_121] : memref<8x32xf32, #tpu.memory_space<vmem>>, vector<8x32xf32>
    %246 = arith.truncf %245 : vector<8x32xf32> to vector<8x32xbf16>
    %c0_122 = arith.constant 0 : index
    %c0_123 = arith.constant 0 : index
    %247 = vector.load %arg2[%c0_122, %c0_123] : memref<32x128xbf16, #tpu.memory_space<vmem>>, vector<32x128xbf16>
    %cst_124 = arith.constant dense<0.000000e+00> : vector<8x128xf32>
    %248 = tpu.matmul %246, %247, %cst_124 {dimension_numbers = #tpu.dot_dimension_numbers<[1], [0], [0], [1], [0, 0, 1, 1], [], []>} : vector<8x32xbf16>, vector<32x128xbf16>, vector<8x128xf32> -> vector<8x128xf32>
    %249 = arith.addf %244, %248 : vector<8x128xf32>
    %250 = vector.extract_strided_slice %249 {offsets = [0, 0], sizes = [8, 32], strides = [1, 1]} : vector<8x128xf32> to vector<8x32xf32>
    %251 = arith.negf %250 : vector<8x32xf32>
    %252 = math.exp %251 : vector<8x32xf32>
    %cst_125 = arith.constant 1.000000e+00 : f32
    %253 = vector.broadcast %cst_125 : f32 to vector<8x32xf32>
    %254 = arith.addf %253, %252 : vector<8x32xf32>
    %255 = arith.divf %253, %254 : vector<8x32xf32>
    %256 = vector.extract_strided_slice %249 {offsets = [0, 32], sizes = [8, 32], strides = [1, 1]} : vector<8x128xf32> to vector<8x32xf32>
    %257 = arith.negf %256 : vector<8x32xf32>
    %258 = math.exp %257 : vector<8x32xf32>
    %cst_126 = arith.constant 1.000000e+00 : f32
    %259 = vector.broadcast %cst_126 : f32 to vector<8x32xf32>
    %260 = arith.addf %259, %258 : vector<8x32xf32>
    %261 = arith.divf %259, %260 : vector<8x32xf32>
    %262 = vector.extract_strided_slice %249 {offsets = [0, 64], sizes = [8, 32], strides = [1, 1]} : vector<8x128xf32> to vector<8x32xf32>
    %263 = math.tanh %262 : vector<8x32xf32>
    %264 = vector.extract_strided_slice %249 {offsets = [0, 96], sizes = [8, 32], strides = [1, 1]} : vector<8x128xf32> to vector<8x32xf32>
    %265 = arith.negf %264 : vector<8x32xf32>
    %266 = math.exp %265 : vector<8x32xf32>
    %cst_127 = arith.constant 1.000000e+00 : f32
    %267 = vector.broadcast %cst_127 : f32 to vector<8x32xf32>
    %268 = arith.addf %267, %266 : vector<8x32xf32>
    %269 = arith.divf %267, %268 : vector<8x32xf32>
    %c0_128 = arith.constant 0 : index
    %c0_129 = arith.constant 0 : index
    %270 = vector.load %arg17[%c0_128, %c0_129] : memref<8x32xf32, #tpu.memory_space<vmem>>, vector<8x32xf32>
    %271 = arith.mulf %261, %270 : vector<8x32xf32>
    %272 = arith.mulf %255, %263 : vector<8x32xf32>
    %273 = arith.addf %271, %272 : vector<8x32xf32>
    %274 = math.tanh %273 : vector<8x32xf32>
    %275 = arith.mulf %269, %274 : vector<8x32xf32>
    %c0_130 = arith.constant 0 : index
    %c0_131 = arith.constant 0 : index
    %276 = vector.load %arg17[%c0_130, %c0_131] : memref<8x32xf32, #tpu.memory_space<vmem>>, vector<8x32xf32>
    tpu.vector_store %arg17[%c0_130, %c0_131], %273 {strides = array<i32>} : memref<8x32xf32, #tpu.memory_space<vmem>>, vector<8x32xf32>,
    %c0_132 = arith.constant 0 : index
    %c0_133 = arith.constant 0 : index
    %277 = vector.load %arg16[%c0_132, %c0_133] : memref<8x32xf32, #tpu.memory_space<vmem>>, vector<8x32xf32>
    tpu.vector_store %arg16[%c0_132, %c0_133], %275 {strides = array<i32>} : memref<8x32xf32, #tpu.memory_space<vmem>>, vector<8x32xf32>,
    %278 = arith.index_cast %242 : i32 to index
    %c0_134 = arith.constant 0 : index
    %279 = vector.load %arg15[%278, %c0_134] : memref<64x32xf32, #tpu.memory_space<vmem>>, vector<8x32xf32>
    tpu.vector_store %arg15[%278, %c0_134], %275 {strides = array<i32>} : memref<64x32xf32, #tpu.memory_space<vmem>>, vector<8x32xf32>,
    %c7_i32 = arith.constant 7 : i32
    %c8_i32_135 = arith.constant 8 : i32
    %280 = arith.muli %c7_i32, %c8_i32_135 : i32
    %281 = arith.index_cast %280 : i32 to index
    %c0_136 = arith.constant 0 : index
    %282 = vector.load %arg14[%281, %c0_136] : memref<64x128xf32, #tpu.memory_space<vmem>>, vector<8x128xf32>
    %c0_137 = arith.constant 0 : index
    %c0_138 = arith.constant 0 : index
    %283 = vector.load %arg16[%c0_137, %c0_138] : memref<8x32xf32, #tpu.memory_space<vmem>>, vector<8x32xf32>
    %284 = arith.truncf %283 : vector<8x32xf32> to vector<8x32xbf16>
    %c0_139 = arith.constant 0 : index
    %c0_140 = arith.constant 0 : index
    %285 = vector.load %arg2[%c0_139, %c0_140] : memref<32x128xbf16, #tpu.memory_space<vmem>>, vector<32x128xbf16>
    %cst_141 = arith.constant dense<0.000000e+00> : vector<8x128xf32>
    %286 = tpu.matmul %284, %285, %cst_141 {dimension_numbers = #tpu.dot_dimension_numbers<[1], [0], [0], [1], [0, 0, 1, 1], [], []>} : vector<8x32xbf16>, vector<32x128xbf16>, vector<8x128xf32> -> vector<8x128xf32>
    %287 = arith.addf %282, %286 : vector<8x128xf32>
    %288 = vector.extract_strided_slice %287 {offsets = [0, 0], sizes = [8, 32], strides = [1, 1]} : vector<8x128xf32> to vector<8x32xf32>
    %289 = arith.negf %288 : vector<8x32xf32>
    %290 = math.exp %289 : vector<8x32xf32>
    %cst_142 = arith.constant 1.000000e+00 : f32
    %291 = vector.broadcast %cst_142 : f32 to vector<8x32xf32>
    %292 = arith.addf %291, %290 : vector<8x32xf32>
    %293 = arith.divf %291, %292 : vector<8x32xf32>
    %294 = vector.extract_strided_slice %287 {offsets = [0, 32], sizes = [8, 32], strides = [1, 1]} : vector<8x128xf32> to vector<8x32xf32>
    %295 = arith.negf %294 : vector<8x32xf32>
    %296 = math.exp %295 : vector<8x32xf32>
    %cst_143 = arith.constant 1.000000e+00 : f32
    %297 = vector.broadcast %cst_143 : f32 to vector<8x32xf32>
    %298 = arith.addf %297, %296 : vector<8x32xf32>
    %299 = arith.divf %297, %298 : vector<8x32xf32>
    %300 = vector.extract_strided_slice %287 {offsets = [0, 64], sizes = [8, 32], strides = [1, 1]} : vector<8x128xf32> to vector<8x32xf32>
    %301 = math.tanh %300 : vector<8x32xf32>
    %302 = vector.extract_strided_slice %287 {offsets = [0, 96], sizes = [8, 32], strides = [1, 1]} : vector<8x128xf32> to vector<8x32xf32>
    %303 = arith.negf %302 : vector<8x32xf32>
    %304 = math.exp %303 : vector<8x32xf32>
    %cst_144 = arith.constant 1.000000e+00 : f32
    %305 = vector.broadcast %cst_144 : f32 to vector<8x32xf32>
    %306 = arith.addf %305, %304 : vector<8x32xf32>
    %307 = arith.divf %305, %306 : vector<8x32xf32>
    %c0_145 = arith.constant 0 : index
    %c0_146 = arith.constant 0 : index
    %308 = vector.load %arg17[%c0_145, %c0_146] : memref<8x32xf32, #tpu.memory_space<vmem>>, vector<8x32xf32>
    %309 = arith.mulf %299, %308 : vector<8x32xf32>
    %310 = arith.mulf %293, %301 : vector<8x32xf32>
    %311 = arith.addf %309, %310 : vector<8x32xf32>
    %312 = math.tanh %311 : vector<8x32xf32>
    %313 = arith.mulf %307, %312 : vector<8x32xf32>
    %c0_147 = arith.constant 0 : index
    %c0_148 = arith.constant 0 : index
    %314 = vector.load %arg17[%c0_147, %c0_148] : memref<8x32xf32, #tpu.memory_space<vmem>>, vector<8x32xf32>
    tpu.vector_store %arg17[%c0_147, %c0_148], %311 {strides = array<i32>} : memref<8x32xf32, #tpu.memory_space<vmem>>, vector<8x32xf32>,
    %c0_149 = arith.constant 0 : index
    %c0_150 = arith.constant 0 : index
    %315 = vector.load %arg16[%c0_149, %c0_150] : memref<8x32xf32, #tpu.memory_space<vmem>>, vector<8x32xf32>
    tpu.vector_store %arg16[%c0_149, %c0_150], %313 {strides = array<i32>} : memref<8x32xf32, #tpu.memory_space<vmem>>, vector<8x32xf32>,
    %316 = arith.index_cast %280 : i32 to index
    %c0_151 = arith.constant 0 : index
    %317 = vector.load %arg15[%316, %c0_151] : memref<64x32xf32, #tpu.memory_space<vmem>>, vector<8x32xf32>
    tpu.vector_store %arg15[%316, %c0_151], %313 {strides = array<i32>} : memref<64x32xf32, #tpu.memory_space<vmem>>, vector<8x32xf32>,
    %c8_i32_152 = arith.constant 8 : i32
    %c0_153 = arith.constant 0 : index
    %c0_154 = arith.constant 0 : index
    %318 = vector.load %arg16[%c0_153, %c0_154] : memref<8x32xf32, #tpu.memory_space<vmem>>, vector<8x32xf32>
    %c0_155 = arith.constant 0 : index
    %c0_156 = arith.constant 0 : index
    %c0_157 = arith.constant 0 : index
    %319 = vector.load %arg12[%c0_155, %c0_156, %c0_157] : memref<2x8x32xf32, #tpu.memory_space<vmem>>, vector<1x8x32xf32>
    %320 = vector.shape_cast %319 : vector<1x8x32xf32> to vector<8x32xf32>
    %321 = vector.shape_cast %318 : vector<8x32xf32> to vector<1x8x32xf32>
    tpu.vector_store %arg12[%c0_155, %c0_156, %c0_157], %321 {strides = array<i32>} : memref<2x8x32xf32, #tpu.memory_space<vmem>>, vector<1x8x32xf32>,
    %c0_158 = arith.constant 0 : index
    %c0_159 = arith.constant 0 : index
    %322 = vector.load %arg17[%c0_158, %c0_159] : memref<8x32xf32, #tpu.memory_space<vmem>>, vector<8x32xf32>
    %c0_160 = arith.constant 0 : index
    %c0_161 = arith.constant 0 : index
    %c0_162 = arith.constant 0 : index
    %323 = vector.load %arg13[%c0_160, %c0_161, %c0_162] : memref<2x8x32xf32, #tpu.memory_space<vmem>>, vector<1x8x32xf32>
    %324 = vector.shape_cast %323 : vector<1x8x32xf32> to vector<8x32xf32>
    %325 = vector.shape_cast %322 : vector<8x32xf32> to vector<1x8x32xf32>
    tpu.vector_store %arg13[%c0_160, %c0_161, %c0_162], %325 {strides = array<i32>} : memref<2x8x32xf32, #tpu.memory_space<vmem>>, vector<1x8x32xf32>,
    %c0_163 = arith.constant 0 : index
    %c0_164 = arith.constant 0 : index
    %326 = vector.load %arg15[%c0_163, %c0_164] : memref<64x32xf32, #tpu.memory_space<vmem>>, vector<64x32xf32>
    %327 = arith.truncf %326 : vector<64x32xf32> to vector<64x32xbf16>
    %c0_165 = arith.constant 0 : index
    %c0_166 = arith.constant 0 : index
    %328 = vector.load %arg4[%c0_165, %c0_166] : memref<32x128xbf16, #tpu.memory_space<vmem>>, vector<32x128xbf16>
    %cst_167 = arith.constant dense<0.000000e+00> : vector<64x128xf32>
    %329 = tpu.matmul %327, %328, %cst_167 {dimension_numbers = #tpu.dot_dimension_numbers<[1], [0], [0], [1], [0, 0, 1, 1], [], []>} : vector<64x32xbf16>, vector<32x128xbf16>, vector<64x128xf32> -> vector<64x128xf32>
    %c0_168 = arith.constant 0 : index
    %c0_169 = arith.constant 0 : index
    %330 = vector.load %arg6[%c0_168, %c0_169] : memref<1x128xf32, #tpu.memory_space<vmem>>, vector<1x128xf32>
    %331 = vector.broadcast %330 : vector<1x128xf32> to vector<64x128xf32>
    %332 = arith.addf %329, %331 : vector<64x128xf32>
    %c0_170 = arith.constant 0 : index
    %c0_171 = arith.constant 0 : index
    %333 = vector.load %arg14[%c0_170, %c0_171] : memref<64x128xf32, #tpu.memory_space<vmem>>, vector<64x128xf32>
    tpu.vector_store %arg14[%c0_170, %c0_171], %332 {strides = array<i32>} : memref<64x128xf32, #tpu.memory_space<vmem>>, vector<64x128xf32>,
    %c1 = arith.constant 1 : index
    %c0_172 = arith.constant 0 : index
    %c0_173 = arith.constant 0 : index
    %334 = vector.load %arg9[%c1, %c0_172, %c0_173] : memref<2x8x32xf32, #tpu.memory_space<vmem>>, vector<1x8x32xf32>
    %335 = vector.shape_cast %334 : vector<1x8x32xf32> to vector<8x32xf32>
    %c0_174 = arith.constant 0 : index
    %c0_175 = arith.constant 0 : index
    %336 = vector.load %arg16[%c0_174, %c0_175] : memref<8x32xf32, #tpu.memory_space<vmem>>, vector<8x32xf32>
    tpu.vector_store %arg16[%c0_174, %c0_175], %335 {strides = array<i32>} : memref<8x32xf32, #tpu.memory_space<vmem>>, vector<8x32xf32>,
    %c1_176 = arith.constant 1 : index
    %c0_177 = arith.constant 0 : index
    %c0_178 = arith.constant 0 : index
    %337 = vector.load %arg10[%c1_176, %c0_177, %c0_178] : memref<2x8x32xf32, #tpu.memory_space<vmem>>, vector<1x8x32xf32>
    %338 = vector.shape_cast %337 : vector<1x8x32xf32> to vector<8x32xf32>
    %c0_179 = arith.constant 0 : index
    %c0_180 = arith.constant 0 : index
    %339 = vector.load %arg17[%c0_179, %c0_180] : memref<8x32xf32, #tpu.memory_space<vmem>>, vector<8x32xf32>
    tpu.vector_store %arg17[%c0_179, %c0_180], %338 {strides = array<i32>} : memref<8x32xf32, #tpu.memory_space<vmem>>, vector<8x32xf32>,
    %c0_i32_181 = arith.constant 0 : i32
    %c8_i32_182 = arith.constant 8 : i32
    %340 = arith.muli %c0_i32_181, %c8_i32_182 : i32
    %341 = arith.index_cast %340 : i32 to index
    %c0_183 = arith.constant 0 : index
    %342 = vector.load %arg14[%341, %c0_183] : memref<64x128xf32, #tpu.memory_space<vmem>>, vector<8x128xf32>
    %c0_184 = arith.constant 0 : index
    %c0_185 = arith.constant 0 : index
    %343 = vector.load %arg16[%c0_184, %c0_185] : memref<8x32xf32, #tpu.memory_space<vmem>>, vector<8x32xf32>
    %344 = arith.truncf %343 : vector<8x32xf32> to vector<8x32xbf16>
    %c0_186 = arith.constant 0 : index
    %c0_187 = arith.constant 0 : index
    %345 = vector.load %arg5[%c0_186, %c0_187] : memref<32x128xbf16, #tpu.memory_space<vmem>>, vector<32x128xbf16>
    %cst_188 = arith.constant dense<0.000000e+00> : vector<8x128xf32>
    %346 = tpu.matmul %344, %345, %cst_188 {dimension_numbers = #tpu.dot_dimension_numbers<[1], [0], [0], [1], [0, 0, 1, 1], [], []>} : vector<8x32xbf16>, vector<32x128xbf16>, vector<8x128xf32> -> vector<8x128xf32>
    %347 = arith.addf %342, %346 : vector<8x128xf32>
    %348 = vector.extract_strided_slice %347 {offsets = [0, 0], sizes = [8, 32], strides = [1, 1]} : vector<8x128xf32> to vector<8x32xf32>
    %349 = arith.negf %348 : vector<8x32xf32>
    %350 = math.exp %349 : vector<8x32xf32>
    %cst_189 = arith.constant 1.000000e+00 : f32
    %351 = vector.broadcast %cst_189 : f32 to vector<8x32xf32>
    %352 = arith.addf %351, %350 : vector<8x32xf32>
    %353 = arith.divf %351, %352 : vector<8x32xf32>
    %354 = vector.extract_strided_slice %347 {offsets = [0, 32], sizes = [8, 32], strides = [1, 1]} : vector<8x128xf32> to vector<8x32xf32>
    %355 = arith.negf %354 : vector<8x32xf32>
    %356 = math.exp %355 : vector<8x32xf32>
    %cst_190 = arith.constant 1.000000e+00 : f32
    %357 = vector.broadcast %cst_190 : f32 to vector<8x32xf32>
    %358 = arith.addf %357, %356 : vector<8x32xf32>
    %359 = arith.divf %357, %358 : vector<8x32xf32>
    %360 = vector.extract_strided_slice %347 {offsets = [0, 64], sizes = [8, 32], strides = [1, 1]} : vector<8x128xf32> to vector<8x32xf32>
    %361 = math.tanh %360 : vector<8x32xf32>
    %362 = vector.extract_strided_slice %347 {offsets = [0, 96], sizes = [8, 32], strides = [1, 1]} : vector<8x128xf32> to vector<8x32xf32>
    %363 = arith.negf %362 : vector<8x32xf32>
    %364 = math.exp %363 : vector<8x32xf32>
    %cst_191 = arith.constant 1.000000e+00 : f32
    %365 = vector.broadcast %cst_191 : f32 to vector<8x32xf32>
    %366 = arith.addf %365, %364 : vector<8x32xf32>
    %367 = arith.divf %365, %366 : vector<8x32xf32>
    %c0_192 = arith.constant 0 : index
    %c0_193 = arith.constant 0 : index
    %368 = vector.load %arg17[%c0_192, %c0_193] : memref<8x32xf32, #tpu.memory_space<vmem>>, vector<8x32xf32>
    %369 = arith.mulf %359, %368 : vector<8x32xf32>
    %370 = arith.mulf %353, %361 : vector<8x32xf32>
    %371 = arith.addf %369, %370 : vector<8x32xf32>
    %372 = math.tanh %371 : vector<8x32xf32>
    %373 = arith.mulf %367, %372 : vector<8x32xf32>
    %c0_194 = arith.constant 0 : index
    %c0_195 = arith.constant 0 : index
    %374 = vector.load %arg17[%c0_194, %c0_195] : memref<8x32xf32, #tpu.memory_space<vmem>>, vector<8x32xf32>
    tpu.vector_store %arg17[%c0_194, %c0_195], %371 {strides = array<i32>} : memref<8x32xf32, #tpu.memory_space<vmem>>, vector<8x32xf32>,
    %c0_196 = arith.constant 0 : index
    %c0_197 = arith.constant 0 : index
    %375 = vector.load %arg16[%c0_196, %c0_197] : memref<8x32xf32, #tpu.memory_space<vmem>>, vector<8x32xf32>
    tpu.vector_store %arg16[%c0_196, %c0_197], %373 {strides = array<i32>} : memref<8x32xf32, #tpu.memory_space<vmem>>, vector<8x32xf32>,
    %376 = arith.index_cast %340 : i32 to index
    %c0_198 = arith.constant 0 : index
    %377 = vector.load %arg15[%376, %c0_198] : memref<64x32xf32, #tpu.memory_space<vmem>>, vector<8x32xf32>
    tpu.vector_store %arg15[%376, %c0_198], %373 {strides = array<i32>} : memref<64x32xf32, #tpu.memory_space<vmem>>, vector<8x32xf32>,
    %c1_i32_199 = arith.constant 1 : i32
    %c8_i32_200 = arith.constant 8 : i32
    %378 = arith.muli %c1_i32_199, %c8_i32_200 : i32
    %379 = arith.index_cast %378 : i32 to index
    %c0_201 = arith.constant 0 : index
    %380 = vector.load %arg14[%379, %c0_201] : memref<64x128xf32, #tpu.memory_space<vmem>>, vector<8x128xf32>
    %c0_202 = arith.constant 0 : index
    %c0_203 = arith.constant 0 : index
    %381 = vector.load %arg16[%c0_202, %c0_203] : memref<8x32xf32, #tpu.memory_space<vmem>>, vector<8x32xf32>
    %382 = arith.truncf %381 : vector<8x32xf32> to vector<8x32xbf16>
    %c0_204 = arith.constant 0 : index
    %c0_205 = arith.constant 0 : index
    %383 = vector.load %arg5[%c0_204, %c0_205] : memref<32x128xbf16, #tpu.memory_space<vmem>>, vector<32x128xbf16>
    %cst_206 = arith.constant dense<0.000000e+00> : vector<8x128xf32>
    %384 = tpu.matmul %382, %383, %cst_206 {dimension_numbers = #tpu.dot_dimension_numbers<[1], [0], [0], [1], [0, 0, 1, 1], [], []>} : vector<8x32xbf16>, vector<32x128xbf16>, vector<8x128xf32> -> vector<8x128xf32>
    %385 = arith.addf %380, %384 : vector<8x128xf32>
    %386 = vector.extract_strided_slice %385 {offsets = [0, 0], sizes = [8, 32], strides = [1, 1]} : vector<8x128xf32> to vector<8x32xf32>
    %387 = arith.negf %386 : vector<8x32xf32>
    %388 = math.exp %387 : vector<8x32xf32>
    %cst_207 = arith.constant 1.000000e+00 : f32
    %389 = vector.broadcast %cst_207 : f32 to vector<8x32xf32>
    %390 = arith.addf %389, %388 : vector<8x32xf32>
    %391 = arith.divf %389, %390 : vector<8x32xf32>
    %392 = vector.extract_strided_slice %385 {offsets = [0, 32], sizes = [8, 32], strides = [1, 1]} : vector<8x128xf32> to vector<8x32xf32>
    %393 = arith.negf %392 : vector<8x32xf32>
    %394 = math.exp %393 : vector<8x32xf32>
    %cst_208 = arith.constant 1.000000e+00 : f32
    %395 = vector.broadcast %cst_208 : f32 to vector<8x32xf32>
    %396 = arith.addf %395, %394 : vector<8x32xf32>
    %397 = arith.divf %395, %396 : vector<8x32xf32>
    %398 = vector.extract_strided_slice %385 {offsets = [0, 64], sizes = [8, 32], strides = [1, 1]} : vector<8x128xf32> to vector<8x32xf32>
    %399 = math.tanh %398 : vector<8x32xf32>
    %400 = vector.extract_strided_slice %385 {offsets = [0, 96], sizes = [8, 32], strides = [1, 1]} : vector<8x128xf32> to vector<8x32xf32>
    %401 = arith.negf %400 : vector<8x32xf32>
    %402 = math.exp %401 : vector<8x32xf32>
    %cst_209 = arith.constant 1.000000e+00 : f32
    %403 = vector.broadcast %cst_209 : f32 to vector<8x32xf32>
    %404 = arith.addf %403, %402 : vector<8x32xf32>
    %405 = arith.divf %403, %404 : vector<8x32xf32>
    %c0_210 = arith.constant 0 : index
    %c0_211 = arith.constant 0 : index
    %406 = vector.load %arg17[%c0_210, %c0_211] : memref<8x32xf32, #tpu.memory_space<vmem>>, vector<8x32xf32>
    %407 = arith.mulf %397, %406 : vector<8x32xf32>
    %408 = arith.mulf %391, %399 : vector<8x32xf32>
    %409 = arith.addf %407, %408 : vector<8x32xf32>
    %410 = math.tanh %409 : vector<8x32xf32>
    %411 = arith.mulf %405, %410 : vector<8x32xf32>
    %c0_212 = arith.constant 0 : index
    %c0_213 = arith.constant 0 : index
    %412 = vector.load %arg17[%c0_212, %c0_213] : memref<8x32xf32, #tpu.memory_space<vmem>>, vector<8x32xf32>
    tpu.vector_store %arg17[%c0_212, %c0_213], %409 {strides = array<i32>} : memref<8x32xf32, #tpu.memory_space<vmem>>, vector<8x32xf32>,
    %c0_214 = arith.constant 0 : index
    %c0_215 = arith.constant 0 : index
    %413 = vector.load %arg16[%c0_214, %c0_215] : memref<8x32xf32, #tpu.memory_space<vmem>>, vector<8x32xf32>
    tpu.vector_store %arg16[%c0_214, %c0_215], %411 {strides = array<i32>} : memref<8x32xf32, #tpu.memory_space<vmem>>, vector<8x32xf32>,
    %414 = arith.index_cast %378 : i32 to index
    %c0_216 = arith.constant 0 : index
    %415 = vector.load %arg15[%414, %c0_216] : memref<64x32xf32, #tpu.memory_space<vmem>>, vector<8x32xf32>
    tpu.vector_store %arg15[%414, %c0_216], %411 {strides = array<i32>} : memref<64x32xf32, #tpu.memory_space<vmem>>, vector<8x32xf32>,
    %c2_i32_217 = arith.constant 2 : i32
    %c8_i32_218 = arith.constant 8 : i32
    %416 = arith.muli %c2_i32_217, %c8_i32_218 : i32
    %417 = arith.index_cast %416 : i32 to index
    %c0_219 = arith.constant 0 : index
    %418 = vector.load %arg14[%417, %c0_219] : memref<64x128xf32, #tpu.memory_space<vmem>>, vector<8x128xf32>
    %c0_220 = arith.constant 0 : index
    %c0_221 = arith.constant 0 : index
    %419 = vector.load %arg16[%c0_220, %c0_221] : memref<8x32xf32, #tpu.memory_space<vmem>>, vector<8x32xf32>
    %420 = arith.truncf %419 : vector<8x32xf32> to vector<8x32xbf16>
    %c0_222 = arith.constant 0 : index
    %c0_223 = arith.constant 0 : index
    %421 = vector.load %arg5[%c0_222, %c0_223] : memref<32x128xbf16, #tpu.memory_space<vmem>>, vector<32x128xbf16>
    %cst_224 = arith.constant dense<0.000000e+00> : vector<8x128xf32>
    %422 = tpu.matmul %420, %421, %cst_224 {dimension_numbers = #tpu.dot_dimension_numbers<[1], [0], [0], [1], [0, 0, 1, 1], [], []>} : vector<8x32xbf16>, vector<32x128xbf16>, vector<8x128xf32> -> vector<8x128xf32>
    %423 = arith.addf %418, %422 : vector<8x128xf32>
    %424 = vector.extract_strided_slice %423 {offsets = [0, 0], sizes = [8, 32], strides = [1, 1]} : vector<8x128xf32> to vector<8x32xf32>
    %425 = arith.negf %424 : vector<8x32xf32>
    %426 = math.exp %425 : vector<8x32xf32>
    %cst_225 = arith.constant 1.000000e+00 : f32
    %427 = vector.broadcast %cst_225 : f32 to vector<8x32xf32>
    %428 = arith.addf %427, %426 : vector<8x32xf32>
    %429 = arith.divf %427, %428 : vector<8x32xf32>
    %430 = vector.extract_strided_slice %423 {offsets = [0, 32], sizes = [8, 32], strides = [1, 1]} : vector<8x128xf32> to vector<8x32xf32>
    %431 = arith.negf %430 : vector<8x32xf32>
    %432 = math.exp %431 : vector<8x32xf32>
    %cst_226 = arith.constant 1.000000e+00 : f32
    %433 = vector.broadcast %cst_226 : f32 to vector<8x32xf32>
    %434 = arith.addf %433, %432 : vector<8x32xf32>
    %435 = arith.divf %433, %434 : vector<8x32xf32>
    %436 = vector.extract_strided_slice %423 {offsets = [0, 64], sizes = [8, 32], strides = [1, 1]} : vector<8x128xf32> to vector<8x32xf32>
    %437 = math.tanh %436 : vector<8x32xf32>
    %438 = vector.extract_strided_slice %423 {offsets = [0, 96], sizes = [8, 32], strides = [1, 1]} : vector<8x128xf32> to vector<8x32xf32>
    %439 = arith.negf %438 : vector<8x32xf32>
    %440 = math.exp %439 : vector<8x32xf32>
    %cst_227 = arith.constant 1.000000e+00 : f32
    %441 = vector.broadcast %cst_227 : f32 to vector<8x32xf32>
    %442 = arith.addf %441, %440 : vector<8x32xf32>
    %443 = arith.divf %441, %442 : vector<8x32xf32>
    %c0_228 = arith.constant 0 : index
    %c0_229 = arith.constant 0 : index
    %444 = vector.load %arg17[%c0_228, %c0_229] : memref<8x32xf32, #tpu.memory_space<vmem>>, vector<8x32xf32>
    %445 = arith.mulf %435, %444 : vector<8x32xf32>
    %446 = arith.mulf %429, %437 : vector<8x32xf32>
    %447 = arith.addf %445, %446 : vector<8x32xf32>
    %448 = math.tanh %447 : vector<8x32xf32>
    %449 = arith.mulf %443, %448 : vector<8x32xf32>
    %c0_230 = arith.constant 0 : index
    %c0_231 = arith.constant 0 : index
    %450 = vector.load %arg17[%c0_230, %c0_231] : memref<8x32xf32, #tpu.memory_space<vmem>>, vector<8x32xf32>
    tpu.vector_store %arg17[%c0_230, %c0_231], %447 {strides = array<i32>} : memref<8x32xf32, #tpu.memory_space<vmem>>, vector<8x32xf32>,
    %c0_232 = arith.constant 0 : index
    %c0_233 = arith.constant 0 : index
    %451 = vector.load %arg16[%c0_232, %c0_233] : memref<8x32xf32, #tpu.memory_space<vmem>>, vector<8x32xf32>
    tpu.vector_store %arg16[%c0_232, %c0_233], %449 {strides = array<i32>} : memref<8x32xf32, #tpu.memory_space<vmem>>, vector<8x32xf32>,
    %452 = arith.index_cast %416 : i32 to index
    %c0_234 = arith.constant 0 : index
    %453 = vector.load %arg15[%452, %c0_234] : memref<64x32xf32, #tpu.memory_space<vmem>>, vector<8x32xf32>
    tpu.vector_store %arg15[%452, %c0_234], %449 {strides = array<i32>} : memref<64x32xf32, #tpu.memory_space<vmem>>, vector<8x32xf32>,
    %c3_i32_235 = arith.constant 3 : i32
    %c8_i32_236 = arith.constant 8 : i32
    %454 = arith.muli %c3_i32_235, %c8_i32_236 : i32
    %455 = arith.index_cast %454 : i32 to index
    %c0_237 = arith.constant 0 : index
    %456 = vector.load %arg14[%455, %c0_237] : memref<64x128xf32, #tpu.memory_space<vmem>>, vector<8x128xf32>
    %c0_238 = arith.constant 0 : index
    %c0_239 = arith.constant 0 : index
    %457 = vector.load %arg16[%c0_238, %c0_239] : memref<8x32xf32, #tpu.memory_space<vmem>>, vector<8x32xf32>
    %458 = arith.truncf %457 : vector<8x32xf32> to vector<8x32xbf16>
    %c0_240 = arith.constant 0 : index
    %c0_241 = arith.constant 0 : index
    %459 = vector.load %arg5[%c0_240, %c0_241] : memref<32x128xbf16, #tpu.memory_space<vmem>>, vector<32x128xbf16>
    %cst_242 = arith.constant dense<0.000000e+00> : vector<8x128xf32>
    %460 = tpu.matmul %458, %459, %cst_242 {dimension_numbers = #tpu.dot_dimension_numbers<[1], [0], [0], [1], [0, 0, 1, 1], [], []>} : vector<8x32xbf16>, vector<32x128xbf16>, vector<8x128xf32> -> vector<8x128xf32>
    %461 = arith.addf %456, %460 : vector<8x128xf32>
    %462 = vector.extract_strided_slice %461 {offsets = [0, 0], sizes = [8, 32], strides = [1, 1]} : vector<8x128xf32> to vector<8x32xf32>
    %463 = arith.negf %462 : vector<8x32xf32>
    %464 = math.exp %463 : vector<8x32xf32>
    %cst_243 = arith.constant 1.000000e+00 : f32
    %465 = vector.broadcast %cst_243 : f32 to vector<8x32xf32>
    %466 = arith.addf %465, %464 : vector<8x32xf32>
    %467 = arith.divf %465, %466 : vector<8x32xf32>
    %468 = vector.extract_strided_slice %461 {offsets = [0, 32], sizes = [8, 32], strides = [1, 1]} : vector<8x128xf32> to vector<8x32xf32>
    %469 = arith.negf %468 : vector<8x32xf32>
    %470 = math.exp %469 : vector<8x32xf32>
    %cst_244 = arith.constant 1.000000e+00 : f32
    %471 = vector.broadcast %cst_244 : f32 to vector<8x32xf32>
    %472 = arith.addf %471, %470 : vector<8x32xf32>
    %473 = arith.divf %471, %472 : vector<8x32xf32>
    %474 = vector.extract_strided_slice %461 {offsets = [0, 64], sizes = [8, 32], strides = [1, 1]} : vector<8x128xf32> to vector<8x32xf32>
    %475 = math.tanh %474 : vector<8x32xf32>
    %476 = vector.extract_strided_slice %461 {offsets = [0, 96], sizes = [8, 32], strides = [1, 1]} : vector<8x128xf32> to vector<8x32xf32>
    %477 = arith.negf %476 : vector<8x32xf32>
    %478 = math.exp %477 : vector<8x32xf32>
    %cst_245 = arith.constant 1.000000e+00 : f32
    %479 = vector.broadcast %cst_245 : f32 to vector<8x32xf32>
    %480 = arith.addf %479, %478 : vector<8x32xf32>
    %481 = arith.divf %479, %480 : vector<8x32xf32>
    %c0_246 = arith.constant 0 : index
    %c0_247 = arith.constant 0 : index
    %482 = vector.load %arg17[%c0_246, %c0_247] : memref<8x32xf32, #tpu.memory_space<vmem>>, vector<8x32xf32>
    %483 = arith.mulf %473, %482 : vector<8x32xf32>
    %484 = arith.mulf %467, %475 : vector<8x32xf32>
    %485 = arith.addf %483, %484 : vector<8x32xf32>
    %486 = math.tanh %485 : vector<8x32xf32>
    %487 = arith.mulf %481, %486 : vector<8x32xf32>
    %c0_248 = arith.constant 0 : index
    %c0_249 = arith.constant 0 : index
    %488 = vector.load %arg17[%c0_248, %c0_249] : memref<8x32xf32, #tpu.memory_space<vmem>>, vector<8x32xf32>
    tpu.vector_store %arg17[%c0_248, %c0_249], %485 {strides = array<i32>} : memref<8x32xf32, #tpu.memory_space<vmem>>, vector<8x32xf32>,
    %c0_250 = arith.constant 0 : index
    %c0_251 = arith.constant 0 : index
    %489 = vector.load %arg16[%c0_250, %c0_251] : memref<8x32xf32, #tpu.memory_space<vmem>>, vector<8x32xf32>
    tpu.vector_store %arg16[%c0_250, %c0_251], %487 {strides = array<i32>} : memref<8x32xf32, #tpu.memory_space<vmem>>, vector<8x32xf32>,
    %490 = arith.index_cast %454 : i32 to index
    %c0_252 = arith.constant 0 : index
    %491 = vector.load %arg15[%490, %c0_252] : memref<64x32xf32, #tpu.memory_space<vmem>>, vector<8x32xf32>
    tpu.vector_store %arg15[%490, %c0_252], %487 {strides = array<i32>} : memref<64x32xf32, #tpu.memory_space<vmem>>, vector<8x32xf32>,
    %c4_i32_253 = arith.constant 4 : i32
    %c8_i32_254 = arith.constant 8 : i32
    %492 = arith.muli %c4_i32_253, %c8_i32_254 : i32
    %493 = arith.index_cast %492 : i32 to index
    %c0_255 = arith.constant 0 : index
    %494 = vector.load %arg14[%493, %c0_255] : memref<64x128xf32, #tpu.memory_space<vmem>>, vector<8x128xf32>
    %c0_256 = arith.constant 0 : index
    %c0_257 = arith.constant 0 : index
    %495 = vector.load %arg16[%c0_256, %c0_257] : memref<8x32xf32, #tpu.memory_space<vmem>>, vector<8x32xf32>
    %496 = arith.truncf %495 : vector<8x32xf32> to vector<8x32xbf16>
    %c0_258 = arith.constant 0 : index
    %c0_259 = arith.constant 0 : index
    %497 = vector.load %arg5[%c0_258, %c0_259] : memref<32x128xbf16, #tpu.memory_space<vmem>>, vector<32x128xbf16>
    %cst_260 = arith.constant dense<0.000000e+00> : vector<8x128xf32>
    %498 = tpu.matmul %496, %497, %cst_260 {dimension_numbers = #tpu.dot_dimension_numbers<[1], [0], [0], [1], [0, 0, 1, 1], [], []>} : vector<8x32xbf16>, vector<32x128xbf16>, vector<8x128xf32> -> vector<8x128xf32>
    %499 = arith.addf %494, %498 : vector<8x128xf32>
    %500 = vector.extract_strided_slice %499 {offsets = [0, 0], sizes = [8, 32], strides = [1, 1]} : vector<8x128xf32> to vector<8x32xf32>
    %501 = arith.negf %500 : vector<8x32xf32>
    %502 = math.exp %501 : vector<8x32xf32>
    %cst_261 = arith.constant 1.000000e+00 : f32
    %503 = vector.broadcast %cst_261 : f32 to vector<8x32xf32>
    %504 = arith.addf %503, %502 : vector<8x32xf32>
    %505 = arith.divf %503, %504 : vector<8x32xf32>
    %506 = vector.extract_strided_slice %499 {offsets = [0, 32], sizes = [8, 32], strides = [1, 1]} : vector<8x128xf32> to vector<8x32xf32>
    %507 = arith.negf %506 : vector<8x32xf32>
    %508 = math.exp %507 : vector<8x32xf32>
    %cst_262 = arith.constant 1.000000e+00 : f32
    %509 = vector.broadcast %cst_262 : f32 to vector<8x32xf32>
    %510 = arith.addf %509, %508 : vector<8x32xf32>
    %511 = arith.divf %509, %510 : vector<8x32xf32>
    %512 = vector.extract_strided_slice %499 {offsets = [0, 64], sizes = [8, 32], strides = [1, 1]} : vector<8x128xf32> to vector<8x32xf32>
    %513 = math.tanh %512 : vector<8x32xf32>
    %514 = vector.extract_strided_slice %499 {offsets = [0, 96], sizes = [8, 32], strides = [1, 1]} : vector<8x128xf32> to vector<8x32xf32>
    %515 = arith.negf %514 : vector<8x32xf32>
    %516 = math.exp %515 : vector<8x32xf32>
    %cst_263 = arith.constant 1.000000e+00 : f32
    %517 = vector.broadcast %cst_263 : f32 to vector<8x32xf32>
    %518 = arith.addf %517, %516 : vector<8x32xf32>
    %519 = arith.divf %517, %518 : vector<8x32xf32>
    %c0_264 = arith.constant 0 : index
    %c0_265 = arith.constant 0 : index
    %520 = vector.load %arg17[%c0_264, %c0_265] : memref<8x32xf32, #tpu.memory_space<vmem>>, vector<8x32xf32>
    %521 = arith.mulf %511, %520 : vector<8x32xf32>
    %522 = arith.mulf %505, %513 : vector<8x32xf32>
    %523 = arith.addf %521, %522 : vector<8x32xf32>
    %524 = math.tanh %523 : vector<8x32xf32>
    %525 = arith.mulf %519, %524 : vector<8x32xf32>
    %c0_266 = arith.constant 0 : index
    %c0_267 = arith.constant 0 : index
    %526 = vector.load %arg17[%c0_266, %c0_267] : memref<8x32xf32, #tpu.memory_space<vmem>>, vector<8x32xf32>
    tpu.vector_store %arg17[%c0_266, %c0_267], %523 {strides = array<i32>} : memref<8x32xf32, #tpu.memory_space<vmem>>, vector<8x32xf32>,
    %c0_268 = arith.constant 0 : index
    %c0_269 = arith.constant 0 : index
    %527 = vector.load %arg16[%c0_268, %c0_269] : memref<8x32xf32, #tpu.memory_space<vmem>>, vector<8x32xf32>
    tpu.vector_store %arg16[%c0_268, %c0_269], %525 {strides = array<i32>} : memref<8x32xf32, #tpu.memory_space<vmem>>, vector<8x32xf32>,
    %528 = arith.index_cast %492 : i32 to index
    %c0_270 = arith.constant 0 : index
    %529 = vector.load %arg15[%528, %c0_270] : memref<64x32xf32, #tpu.memory_space<vmem>>, vector<8x32xf32>
    tpu.vector_store %arg15[%528, %c0_270], %525 {strides = array<i32>} : memref<64x32xf32, #tpu.memory_space<vmem>>, vector<8x32xf32>,
    %c5_i32_271 = arith.constant 5 : i32
    %c8_i32_272 = arith.constant 8 : i32
    %530 = arith.muli %c5_i32_271, %c8_i32_272 : i32
    %531 = arith.index_cast %530 : i32 to index
    %c0_273 = arith.constant 0 : index
    %532 = vector.load %arg14[%531, %c0_273] : memref<64x128xf32, #tpu.memory_space<vmem>>, vector<8x128xf32>
    %c0_274 = arith.constant 0 : index
    %c0_275 = arith.constant 0 : index
    %533 = vector.load %arg16[%c0_274, %c0_275] : memref<8x32xf32, #tpu.memory_space<vmem>>, vector<8x32xf32>
    %534 = arith.truncf %533 : vector<8x32xf32> to vector<8x32xbf16>
    %c0_276 = arith.constant 0 : index
    %c0_277 = arith.constant 0 : index
    %535 = vector.load %arg5[%c0_276, %c0_277] : memref<32x128xbf16, #tpu.memory_space<vmem>>, vector<32x128xbf16>
    %cst_278 = arith.constant dense<0.000000e+00> : vector<8x128xf32>
    %536 = tpu.matmul %534, %535, %cst_278 {dimension_numbers = #tpu.dot_dimension_numbers<[1], [0], [0], [1], [0, 0, 1, 1], [], []>} : vector<8x32xbf16>, vector<32x128xbf16>, vector<8x128xf32> -> vector<8x128xf32>
    %537 = arith.addf %532, %536 : vector<8x128xf32>
    %538 = vector.extract_strided_slice %537 {offsets = [0, 0], sizes = [8, 32], strides = [1, 1]} : vector<8x128xf32> to vector<8x32xf32>
    %539 = arith.negf %538 : vector<8x32xf32>
    %540 = math.exp %539 : vector<8x32xf32>
    %cst_279 = arith.constant 1.000000e+00 : f32
    %541 = vector.broadcast %cst_279 : f32 to vector<8x32xf32>
    %542 = arith.addf %541, %540 : vector<8x32xf32>
    %543 = arith.divf %541, %542 : vector<8x32xf32>
    %544 = vector.extract_strided_slice %537 {offsets = [0, 32], sizes = [8, 32], strides = [1, 1]} : vector<8x128xf32> to vector<8x32xf32>
    %545 = arith.negf %544 : vector<8x32xf32>
    %546 = math.exp %545 : vector<8x32xf32>
    %cst_280 = arith.constant 1.000000e+00 : f32
    %547 = vector.broadcast %cst_280 : f32 to vector<8x32xf32>
    %548 = arith.addf %547, %546 : vector<8x32xf32>
    %549 = arith.divf %547, %548 : vector<8x32xf32>
    %550 = vector.extract_strided_slice %537 {offsets = [0, 64], sizes = [8, 32], strides = [1, 1]} : vector<8x128xf32> to vector<8x32xf32>
    %551 = math.tanh %550 : vector<8x32xf32>
    %552 = vector.extract_strided_slice %537 {offsets = [0, 96], sizes = [8, 32], strides = [1, 1]} : vector<8x128xf32> to vector<8x32xf32>
    %553 = arith.negf %552 : vector<8x32xf32>
    %554 = math.exp %553 : vector<8x32xf32>
    %cst_281 = arith.constant 1.000000e+00 : f32
    %555 = vector.broadcast %cst_281 : f32 to vector<8x32xf32>
    %556 = arith.addf %555, %554 : vector<8x32xf32>
    %557 = arith.divf %555, %556 : vector<8x32xf32>
    %c0_282 = arith.constant 0 : index
    %c0_283 = arith.constant 0 : index
    %558 = vector.load %arg17[%c0_282, %c0_283] : memref<8x32xf32, #tpu.memory_space<vmem>>, vector<8x32xf32>
    %559 = arith.mulf %549, %558 : vector<8x32xf32>
    %560 = arith.mulf %543, %551 : vector<8x32xf32>
    %561 = arith.addf %559, %560 : vector<8x32xf32>
    %562 = math.tanh %561 : vector<8x32xf32>
    %563 = arith.mulf %557, %562 : vector<8x32xf32>
    %c0_284 = arith.constant 0 : index
    %c0_285 = arith.constant 0 : index
    %564 = vector.load %arg17[%c0_284, %c0_285] : memref<8x32xf32, #tpu.memory_space<vmem>>, vector<8x32xf32>
    tpu.vector_store %arg17[%c0_284, %c0_285], %561 {strides = array<i32>} : memref<8x32xf32, #tpu.memory_space<vmem>>, vector<8x32xf32>,
    %c0_286 = arith.constant 0 : index
    %c0_287 = arith.constant 0 : index
    %565 = vector.load %arg16[%c0_286, %c0_287] : memref<8x32xf32, #tpu.memory_space<vmem>>, vector<8x32xf32>
    tpu.vector_store %arg16[%c0_286, %c0_287], %563 {strides = array<i32>} : memref<8x32xf32, #tpu.memory_space<vmem>>, vector<8x32xf32>,
    %566 = arith.index_cast %530 : i32 to index
    %c0_288 = arith.constant 0 : index
    %567 = vector.load %arg15[%566, %c0_288] : memref<64x32xf32, #tpu.memory_space<vmem>>, vector<8x32xf32>
    tpu.vector_store %arg15[%566, %c0_288], %563 {strides = array<i32>} : memref<64x32xf32, #tpu.memory_space<vmem>>, vector<8x32xf32>,
    %c6_i32_289 = arith.constant 6 : i32
    %c8_i32_290 = arith.constant 8 : i32
    %568 = arith.muli %c6_i32_289, %c8_i32_290 : i32
    %569 = arith.index_cast %568 : i32 to index
    %c0_291 = arith.constant 0 : index
    %570 = vector.load %arg14[%569, %c0_291] : memref<64x128xf32, #tpu.memory_space<vmem>>, vector<8x128xf32>
    %c0_292 = arith.constant 0 : index
    %c0_293 = arith.constant 0 : index
    %571 = vector.load %arg16[%c0_292, %c0_293] : memref<8x32xf32, #tpu.memory_space<vmem>>, vector<8x32xf32>
    %572 = arith.truncf %571 : vector<8x32xf32> to vector<8x32xbf16>
    %c0_294 = arith.constant 0 : index
    %c0_295 = arith.constant 0 : index
    %573 = vector.load %arg5[%c0_294, %c0_295] : memref<32x128xbf16, #tpu.memory_space<vmem>>, vector<32x128xbf16>
    %cst_296 = arith.constant dense<0.000000e+00> : vector<8x128xf32>
    %574 = tpu.matmul %572, %573, %cst_296 {dimension_numbers = #tpu.dot_dimension_numbers<[1], [0], [0], [1], [0, 0, 1, 1], [], []>} : vector<8x32xbf16>, vector<32x128xbf16>, vector<8x128xf32> -> vector<8x128xf32>
    %575 = arith.addf %570, %574 : vector<8x128xf32>
    %576 = vector.extract_strided_slice %575 {offsets = [0, 0], sizes = [8, 32], strides = [1, 1]} : vector<8x128xf32> to vector<8x32xf32>
    %577 = arith.negf %576 : vector<8x32xf32>
    %578 = math.exp %577 : vector<8x32xf32>
    %cst_297 = arith.constant 1.000000e+00 : f32
    %579 = vector.broadcast %cst_297 : f32 to vector<8x32xf32>
    %580 = arith.addf %579, %578 : vector<8x32xf32>
    %581 = arith.divf %579, %580 : vector<8x32xf32>
    %582 = vector.extract_strided_slice %575 {offsets = [0, 32], sizes = [8, 32], strides = [1, 1]} : vector<8x128xf32> to vector<8x32xf32>
    %583 = arith.negf %582 : vector<8x32xf32>
    %584 = math.exp %583 : vector<8x32xf32>
    %cst_298 = arith.constant 1.000000e+00 : f32
    %585 = vector.broadcast %cst_298 : f32 to vector<8x32xf32>
    %586 = arith.addf %585, %584 : vector<8x32xf32>
    %587 = arith.divf %585, %586 : vector<8x32xf32>
    %588 = vector.extract_strided_slice %575 {offsets = [0, 64], sizes = [8, 32], strides = [1, 1]} : vector<8x128xf32> to vector<8x32xf32>
    %589 = math.tanh %588 : vector<8x32xf32>
    %590 = vector.extract_strided_slice %575 {offsets = [0, 96], sizes = [8, 32], strides = [1, 1]} : vector<8x128xf32> to vector<8x32xf32>
    %591 = arith.negf %590 : vector<8x32xf32>
    %592 = math.exp %591 : vector<8x32xf32>
    %cst_299 = arith.constant 1.000000e+00 : f32
    %593 = vector.broadcast %cst_299 : f32 to vector<8x32xf32>
    %594 = arith.addf %593, %592 : vector<8x32xf32>
    %595 = arith.divf %593, %594 : vector<8x32xf32>
    %c0_300 = arith.constant 0 : index
    %c0_301 = arith.constant 0 : index
    %596 = vector.load %arg17[%c0_300, %c0_301] : memref<8x32xf32, #tpu.memory_space<vmem>>, vector<8x32xf32>
    %597 = arith.mulf %587, %596 : vector<8x32xf32>
    %598 = arith.mulf %581, %589 : vector<8x32xf32>
    %599 = arith.addf %597, %598 : vector<8x32xf32>
    %600 = math.tanh %599 : vector<8x32xf32>
    %601 = arith.mulf %595, %600 : vector<8x32xf32>
    %c0_302 = arith.constant 0 : index
    %c0_303 = arith.constant 0 : index
    %602 = vector.load %arg17[%c0_302, %c0_303] : memref<8x32xf32, #tpu.memory_space<vmem>>, vector<8x32xf32>
    tpu.vector_store %arg17[%c0_302, %c0_303], %599 {strides = array<i32>} : memref<8x32xf32, #tpu.memory_space<vmem>>, vector<8x32xf32>,
    %c0_304 = arith.constant 0 : index
    %c0_305 = arith.constant 0 : index
    %603 = vector.load %arg16[%c0_304, %c0_305] : memref<8x32xf32, #tpu.memory_space<vmem>>, vector<8x32xf32>
    tpu.vector_store %arg16[%c0_304, %c0_305], %601 {strides = array<i32>} : memref<8x32xf32, #tpu.memory_space<vmem>>, vector<8x32xf32>,
    %604 = arith.index_cast %568 : i32 to index
    %c0_306 = arith.constant 0 : index
    %605 = vector.load %arg15[%604, %c0_306] : memref<64x32xf32, #tpu.memory_space<vmem>>, vector<8x32xf32>
    tpu.vector_store %arg15[%604, %c0_306], %601 {strides = array<i32>} : memref<64x32xf32, #tpu.memory_space<vmem>>, vector<8x32xf32>,
    %c7_i32_307 = arith.constant 7 : i32
    %c8_i32_308 = arith.constant 8 : i32
    %606 = arith.muli %c7_i32_307, %c8_i32_308 : i32
    %607 = arith.index_cast %606 : i32 to index
    %c0_309 = arith.constant 0 : index
    %608 = vector.load %arg14[%607, %c0_309] : memref<64x128xf32, #tpu.memory_space<vmem>>, vector<8x128xf32>
    %c0_310 = arith.constant 0 : index
    %c0_311 = arith.constant 0 : index
    %609 = vector.load %arg16[%c0_310, %c0_311] : memref<8x32xf32, #tpu.memory_space<vmem>>, vector<8x32xf32>
    %610 = arith.truncf %609 : vector<8x32xf32> to vector<8x32xbf16>
    %c0_312 = arith.constant 0 : index
    %c0_313 = arith.constant 0 : index
    %611 = vector.load %arg5[%c0_312, %c0_313] : memref<32x128xbf16, #tpu.memory_space<vmem>>, vector<32x128xbf16>
    %cst_314 = arith.constant dense<0.000000e+00> : vector<8x128xf32>
    %612 = tpu.matmul %610, %611, %cst_314 {dimension_numbers = #tpu.dot_dimension_numbers<[1], [0], [0], [1], [0, 0, 1, 1], [], []>} : vector<8x32xbf16>, vector<32x128xbf16>, vector<8x128xf32> -> vector<8x128xf32>
    %613 = arith.addf %608, %612 : vector<8x128xf32>
    %614 = vector.extract_strided_slice %613 {offsets = [0, 0], sizes = [8, 32], strides = [1, 1]} : vector<8x128xf32> to vector<8x32xf32>
    %615 = arith.negf %614 : vector<8x32xf32>
    %616 = math.exp %615 : vector<8x32xf32>
    %cst_315 = arith.constant 1.000000e+00 : f32
    %617 = vector.broadcast %cst_315 : f32 to vector<8x32xf32>
    %618 = arith.addf %617, %616 : vector<8x32xf32>
    %619 = arith.divf %617, %618 : vector<8x32xf32>
    %620 = vector.extract_strided_slice %613 {offsets = [0, 32], sizes = [8, 32], strides = [1, 1]} : vector<8x128xf32> to vector<8x32xf32>
    %621 = arith.negf %620 : vector<8x32xf32>
    %622 = math.exp %621 : vector<8x32xf32>
    %cst_316 = arith.constant 1.000000e+00 : f32
    %623 = vector.broadcast %cst_316 : f32 to vector<8x32xf32>
    %624 = arith.addf %623, %622 : vector<8x32xf32>
    %625 = arith.divf %623, %624 : vector<8x32xf32>
    %626 = vector.extract_strided_slice %613 {offsets = [0, 64], sizes = [8, 32], strides = [1, 1]} : vector<8x128xf32> to vector<8x32xf32>
    %627 = math.tanh %626 : vector<8x32xf32>
    %628 = vector.extract_strided_slice %613 {offsets = [0, 96], sizes = [8, 32], strides = [1, 1]} : vector<8x128xf32> to vector<8x32xf32>
    %629 = arith.negf %628 : vector<8x32xf32>
    %630 = math.exp %629 : vector<8x32xf32>
    %cst_317 = arith.constant 1.000000e+00 : f32
    %631 = vector.broadcast %cst_317 : f32 to vector<8x32xf32>
    %632 = arith.addf %631, %630 : vector<8x32xf32>
    %633 = arith.divf %631, %632 : vector<8x32xf32>
    %c0_318 = arith.constant 0 : index
    %c0_319 = arith.constant 0 : index
    %634 = vector.load %arg17[%c0_318, %c0_319] : memref<8x32xf32, #tpu.memory_space<vmem>>, vector<8x32xf32>
    %635 = arith.mulf %625, %634 : vector<8x32xf32>
    %636 = arith.mulf %619, %627 : vector<8x32xf32>
    %637 = arith.addf %635, %636 : vector<8x32xf32>
    %638 = math.tanh %637 : vector<8x32xf32>
    %639 = arith.mulf %633, %638 : vector<8x32xf32>
    %c0_320 = arith.constant 0 : index
    %c0_321 = arith.constant 0 : index
    %640 = vector.load %arg17[%c0_320, %c0_321] : memref<8x32xf32, #tpu.memory_space<vmem>>, vector<8x32xf32>
    tpu.vector_store %arg17[%c0_320, %c0_321], %637 {strides = array<i32>} : memref<8x32xf32, #tpu.memory_space<vmem>>, vector<8x32xf32>,
    %c0_322 = arith.constant 0 : index
    %c0_323 = arith.constant 0 : index
    %641 = vector.load %arg16[%c0_322, %c0_323] : memref<8x32xf32, #tpu.memory_space<vmem>>, vector<8x32xf32>
    tpu.vector_store %arg16[%c0_322, %c0_323], %639 {strides = array<i32>} : memref<8x32xf32, #tpu.memory_space<vmem>>, vector<8x32xf32>,
    %642 = arith.index_cast %606 : i32 to index
    %c0_324 = arith.constant 0 : index
    %643 = vector.load %arg15[%642, %c0_324] : memref<64x32xf32, #tpu.memory_space<vmem>>, vector<8x32xf32>
    tpu.vector_store %arg15[%642, %c0_324], %639 {strides = array<i32>} : memref<64x32xf32, #tpu.memory_space<vmem>>, vector<8x32xf32>,
    %c8_i32_325 = arith.constant 8 : i32
    %c0_326 = arith.constant 0 : index
    %c0_327 = arith.constant 0 : index
    %644 = vector.load %arg16[%c0_326, %c0_327] : memref<8x32xf32, #tpu.memory_space<vmem>>, vector<8x32xf32>
    %c1_328 = arith.constant 1 : index
    %c0_329 = arith.constant 0 : index
    %c0_330 = arith.constant 0 : index
    %645 = vector.load %arg12[%c1_328, %c0_329, %c0_330] : memref<2x8x32xf32, #tpu.memory_space<vmem>>, vector<1x8x32xf32>
    %646 = vector.shape_cast %645 : vector<1x8x32xf32> to vector<8x32xf32>
    %647 = vector.shape_cast %644 : vector<8x32xf32> to vector<1x8x32xf32>
    tpu.vector_store %arg12[%c1_328, %c0_329, %c0_330], %647 {strides = array<i32>} : memref<2x8x32xf32, #tpu.memory_space<vmem>>, vector<1x8x32xf32>,
    %c0_331 = arith.constant 0 : index
    %c0_332 = arith.constant 0 : index
    %648 = vector.load %arg17[%c0_331, %c0_332] : memref<8x32xf32, #tpu.memory_space<vmem>>, vector<8x32xf32>
    %c1_333 = arith.constant 1 : index
    %c0_334 = arith.constant 0 : index
    %c0_335 = arith.constant 0 : index
    %649 = vector.load %arg13[%c1_333, %c0_334, %c0_335] : memref<2x8x32xf32, #tpu.memory_space<vmem>>, vector<1x8x32xf32>
    %650 = vector.shape_cast %649 : vector<1x8x32xf32> to vector<8x32xf32>
    %651 = vector.shape_cast %648 : vector<8x32xf32> to vector<1x8x32xf32>
    tpu.vector_store %arg13[%c1_333, %c0_334, %c0_335], %651 {strides = array<i32>} : memref<2x8x32xf32, #tpu.memory_space<vmem>>, vector<1x8x32xf32>,
    %c0_336 = arith.constant 0 : index
    %c0_337 = arith.constant 0 : index
    %652 = vector.load %arg15[%c0_336, %c0_337] : memref<64x32xf32, #tpu.memory_space<vmem>>, vector<64x32xf32>
    %653 = arith.truncf %652 : vector<64x32xf32> to vector<64x32xbf16>
    %c0_338 = arith.constant 0 : index
    %c0_339 = arith.constant 0 : index
    %654 = vector.load %arg7[%c0_338, %c0_339] : memref<32x64xbf16, #tpu.memory_space<vmem>>, vector<32x64xbf16>
    %cst_340 = arith.constant dense<0.000000e+00> : vector<64x64xf32>
    %655 = tpu.matmul %653, %654, %cst_340 {dimension_numbers = #tpu.dot_dimension_numbers<[1], [0], [0], [1], [0, 0, 1, 1], [], []>} : vector<64x32xbf16>, vector<32x64xbf16>, vector<64x64xf32> -> vector<64x64xf32>
    %c0_341 = arith.constant 0 : index
    %c0_342 = arith.constant 0 : index
    %656 = vector.load %arg8[%c0_341, %c0_342] : memref<1x64xf32, #tpu.memory_space<vmem>>, vector<1x64xf32>
    %657 = vector.broadcast %656 : vector<1x64xf32> to vector<64x64xf32>
    %658 = arith.addf %655, %657 : vector<64x64xf32>
    %c0_343 = arith.constant 0 : index
    %c0_344 = arith.constant 0 : index
    %659 = vector.load %arg11[%c0_343, %c0_344] : memref<64x64xf32, #tpu.memory_space<vmem>>, vector<64x64xf32>
    tpu.vector_store %arg11[%c0_343, %c0_344], %658 {strides = array<i32>} : memref<64x64xf32, #tpu.memory_space<vmem>>, vector<64x64xf32>,
    return
  }
}

</mosaic_0001>

<bundles_post_ra>
// kernel: poetry_model_forward.1
= control target key start
LH: loop header
LB: loop body
LE: loop exit
PB: predicated region body
PF: predicated region fallthrough
CT: control target
= control target key end

     0   :  { %19 = vsyncpa [#allocation7], 0  ;;  %vm79_vm0 = vcmask 261120   ;;  %v2682_v16 = vmov 0.0   ;;  %vm2683_vm1 = vmmov 0   ;;  %s3257_s0 = inlined_call_operand.vmem [shape: f32[64,32], index: 0, kind: input, shape index: {}]   ;;  %s3258_s1 = inlined_call_operand.vmem [shape: bf16[32,128], index: 1, kind: input, shape index: {}]   ;;  %s3259_s2 = inlined_call_operand.vmem [shape: bf16[32,128], index: 2, kind: input, shape index: {}]   ;;  %s3260_s3 = inlined_call_operand.vmem [shape: f32[1,128], index: 3, kind: input, shape index: {}]   ;;  %s3261_s4 = inlined_call_operand.vmem [shape: bf16[32,128], index: 4, kind: input, shape index: {}]   ;;  %s3262_s5 = inlined_call_operand.vmem [shape: bf16[32,128], index: 5, kind: input, shape index: {}]   ;;  %s3263_s6 = inlined_call_operand.vmem [shape: f32[1,128], index: 6, kind: input, shape index: {}]   ;;  %s3264_s7 = inlined_call_operand.vmem [shape: bf16[32,64], index: 7, kind: input, shape index: {}]   ;;  %s3265_s8 = inlined_call_operand.vmem [shape: f32[1,64], index: 8, kind: input, shape index: {}]   ;;  %s3266_s9 = inlined_call_operand.vmem [shape: f32[2,8,32], index: 9, kind: input, shape index: {}, may-alias: {9,10}]   ;;  %s3267_s10 = inlined_call_operand.vmem [shape: f32[2,8,32], index: 10, kind: input, shape index: {}, may-alias: {9,10}]   ;;  %s3268_s11 = inlined_call_operand.hbm [shape: f32[64,64], index: 11, kind: output, shape index: {0}]   ;;  %s3269_s12 = inlined_call_operand.hbm [shape: f32[2,8,32], index: 12, kind: output, shape index: {1}]   ;;  %s3270_s13 = inlined_call_operand.hbm [shape: f32[2,8,32], index: 13, kind: output, shape index: {2}]  }
   0x1   :  { %v2452_v0 = vld [vmem:[%s3258_s1 + $0x8] sm:$0xff]   ;;  %v2453_v1 = vld [vmem:[%s3258_s1] sm:$0xff]   ;;  %v46_v7 = vld [vmem:[%s3257_s0 + $0x10] sm:$0xff] }
   0x2   :  { %2274 = vmatprep.subr.bf16.mxu0 %v2452_v0  ;;  %2438 = vmatprep.subr.bf16.mxu1 %v2452_v0  ;;  %v44_v2 = vld [vmem:[%s3257_s0] sm:$0xff]  ;;  %v45_v3 = vld [vmem:[%s3257_s0 + $0x8] sm:$0xff]  ;;  %v47_v8 = vld [vmem:[%s3257_s0 + $0x18] sm:$0xff] }
   0x3   :  { %v48_v4 = vld [vmem:[%s3257_s0 + $0x20] sm:$0xff]  ;;  %2275 = vmatpush3.bf16.msra.mxu0 %v2452_v0  ;;  %2440 = vmatpush3.bf16.msra.mxu1 %v2452_v0  ;;  %v52_v5 = vpack.c.bf16 %v45_v3, %v44_v2  ;;  %v49_v6 = vld [vmem:[%s3257_s0 + $0x28] sm:$0xff]  ;;  %v50_v10 = vld [vmem:[%s3257_s0 + $0x30] sm:$0xff]  ;;  %v53_v12 = vpack.c.bf16 %v47_v8, %v46_v7 }
   0x4   :  { %2276 = vmatprep.subr.bf16.mxu0 %v2453_v1  ;;  %2439 = vmatprep.subr.bf16.mxu1 %v2453_v1  ;;  %v54_v9 = vpack.c.bf16 %v49_v6, %v48_v4  ;;  %v51_v11 = vld [vmem:[%s3257_s0 + $0x38] sm:$0xff]  ;;  %v2454_v14 = vld [vmem:[%s3259_s2 + $0x8] sm:$0xff]   ;;  %v165_v15 = vld [vmem:[%s3266_s9] sm:$0xff] }
   0x5   :  { %2278 = vmatprep.mubr.msk.bf16.mxu0 %vm79_vm0, %v52_v5  ;;  %v55_v13 = vpack.c.bf16 %v51_v11, %v50_v10  ;;  %166 = vst.msk [vmem:[#allocation4] sm:$0xff] %vm79_vm0, %v165_v15  ;;  %v2455_v17 = vld [vmem:[%s3259_s2] sm:$0xff]  }
   0x6   :  { %2282 = vmatprep.mubr.msk.bf16.mxu1 %vm79_vm0, %v54_v9 }
   0x7   :  { %2277 = vmatpush3.bf16.msra.mxu0 %v2453_v1  ;;  %2441 = vmatpush3.bf16.msra.mxu1 %v2453_v1 }
   0x8   :  { %2286 = vmatprep.subr.bf16.mxu1 %v2682_v16  ;;  %2302 = vmatprep.subr.bf16.mxu0 %v2682_v16 }
   0xa   :  { %2279 = vmatmul.mubr.msk.bf16.vlgmr.msra.gmra.mxu0 %vm79_vm0, %v53_v12  ;;  %2283 = vmatmul.mubr.msk.bf16.vlgmr.msra.gmra.mxu1 %vm79_vm0, %v55_v13 }
   0xb   :  { %2287 = vmatpush3.bf16.msra.mxu1 %v2454_v14  ;;  %2290 = vmatprep.mubr.msk.bf16.mxu1 %vm2683_vm1, %v2682_v16 }
   0xc   :  { %2288 = vmatprep.subr.bf16.mxu1 %v2682_v16  ;;  %2306 = vmatprep.mubr.msk.bf16.mxu0 %vm2683_vm1, %v2682_v16  ;;  %v170_v18 = vld [vmem:[#allocation4] sm:$0xff] }
   0xd   :  { %v171_v19 = vpack.c.bf16 %v170_v18, %v170_v18 }
   0xf   :  { %2289 = vmatpush3.bf16.msra.mxu1 %v2455_v17 }
  0x10   :  { %2294 = vmatprep.subr.bf16.mxu1 %v2682_v16 }
  0x12   :  { %2291 = vmatmul.mubr.msk.bf16.vlgmr.msra.gmra.mxu1 %vm79_vm0, %v171_v19 }
  0x13   :  { %2298 = vmatprep.mubr.msk.bf16.mxu1 %vm2683_vm1, %v2682_v16 }
  0x14   :  { %20 = vsyncpa [#allocation9], 0  ;;  %v167_v20 = vld [vmem:[%s3267_s10] sm:$0xff]  ;;  %s2685_s1 = smov 32   ;;  %s2686_s19 = smov 96   ;;  %v2456_v54 = vld [vmem:[%s3259_s2 + $0x8] sm:$0xff]  }
  0x15   :  { %168 = vst.msk [vmem:[#allocation5] sm:$0xff] %vm79_vm0, %v167_v20  ;;  %v2824_v21 = vld [vmem:[%s3260_s3] ss:$0 sm:$0xff]  ;;  %s2684_s3 = smov 64   ;;  %2295 = vmatpush3.bf16.msra.mxu1 %v2456_v54  ;;  %v2458_v19 = vld [vmem:[%s3259_s2 + $0x8] sm:$0xff]   ;;  %vm2065_vm2 = vcmask 523264  }
  0x16   :  { %v2457_v55 = vld [vmem:[%s3259_s2] sm:$0xff]   ;;  %2296 = vmatprep.subr.bf16.mxu1 %v2682_v16  ;;  %2303 = vmatpush3.bf16.msra.mxu0 %v2458_v19 }
  0x17   :  { %v2459_v20 = vld [vmem:[%s3259_s2] sm:$0xff]   ;;  %2304 = vmatprep.subr.bf16.mxu0 %v2682_v16 }
  0x19   :  { %2297 = vmatpush3.bf16.msra.mxu1 %v2457_v55 }
  0x1a   :  { %2310 = vmatprep.subr.bf16.mxu1 %v2682_v16  ;;  %2305 = vmatpush3.bf16.msra.mxu0 %v2459_v20 }
  0x1b   :  { %2318 = vmatprep.subr.bf16.mxu0 %v2682_v16 }
  0x1c   :  { %v239_v42 = vld [vmem:[#allocation5] sm:$0xff] }
  0xca   :  { %v2280_v22 = vpop.f32.mrf.mxu0  ;;  %v2284_v23 = vpop.f32.mrf.mxu1 }
  0xcb   :  { %v2827_v24 = vadd.f32 %v2280_v22, %v2824_v21  ;;  %v2830_v25 = vadd.f32 %v2284_v23, %v2824_v21 }
  0xcc   :  { %v126_v26 = vpop.f32.mrf.mxu0  ;;  %v142_v27 = vpop.f32.mrf.mxu1 }
  0xcd   :  { %v2833_v28 = vadd.f32 %v2824_v21, %v142_v27  ;;  %v127_v34 = vadd.f32 %v2824_v21, %v126_v26 }
  0xce   :  { %v2281_v29 = vpop.f32.mrf.mxu0  ;;  %v2285_v30 = vpop.f32.mrf.mxu1 }
  0xcf   :  { %v2836_v31 = vadd.f32 %v2281_v29, %v2824_v21  ;;  %v2839_v32 = vadd.f32 %v2285_v30, %v2824_v21 }
  0xd0   :  { %v145_v33 = vpop.f32.mrf.mxu1  ;;  %v129_v63 = vpop.f32.mrf.mxu0 }
  0xd1   :  { %v2843_v35 = vadd.f32 %v2824_v21, %v145_v33  ;;  %v130_v0 = vadd.f32 %v2824_v21, %v129_v63 }
  0xd2   :  { %v225_v36 = vpop.f32.mrf.mxu1 }
  0xd3   :  { %v231_v37 = vadd.f32 %v225_v36, %v127_v34 }
  0xd4   :  { %v2292_v38 = vpop.f32.mrf.mxu1 }
  0xd5   :  { %2490 = vtanh.f32 %v231_v37  ;;  %v2131_v43 = vmul.f32 -1.442695, %v231_v37 }
  0xd6   :  { %v228_v39 = vpop.f32.mrf.mxu1 }
  0xd7   :  { %2492 = vpow2.f32 %v2131_v43 }
  0xd8   :  { %v2293_v40 = vpop.f32.mrf.mxu1 }
  0xe2   :  { %v2491_v41 = vpop.eup %2490 }
  0xe3   :  { %246 = vrot.lane.b32.xlu0 %v2491_v41, %s2684_s3 }
  0xe4   :  { %v2493_v44 = vpop.eup %2492 }
  0xe5   :  { %v235_v45 = vadd.f32 1.0, %v2493_v44 }
  0xe7   :  { %241 = vrot.lane.b32.xlu0 %v239_v42, %s2685_s1  ;;  %2494 = vrcp.f32 %v235_v45 }
  0xf4   :  { %v2495_v46 = vpop.eup %2494 }
 0x155   :  { %v247_v47 = vpop.permute.xlu0 %246 }
 0x156   :  { %v249_v48 = vmul.f32 %v2495_v46, %v247_v47 }
 0x158   :  { %251 = vrot.lane.b32.xlu1 %v249_v48, %s2685_s1 }
 0x159   :  { %v242_v49 = vpop.permute.xlu0 %241 }
 0x15a   :  { %v244_v50 = vmul.f32 %v2495_v46, %v242_v49 }
 0x1ca   :  { %v252_v51 = vpop.permute.xlu1 %251 }
 0x1cb   :  { %v254_v52 = vadd.f32 %v252_v51, %v244_v50  ;;  %v2460_v50 = vld [vmem:[%s3259_s2 + $0x8] sm:$0xff]   ;;  %v2461_v51 = vld [vmem:[%s3259_s2] sm:$0xff]  }
 0x1cd   :  { %2496 = vtanh.f32 %v254_v52 }
 0x1da   :  { %v2497_v53 = vpop.eup %2496 }
 0x1db   :  { %257 = vrot.lane.b32.xlu1 %v2497_v53, %s2684_s3 }
 0x1df   :  { %262 = vrot.lane.b32.xlu1 %v254_v52, %s2686_s19 }
 0x24d   :  { %v258_v56 = vpop.permute.xlu1 %257 }
 0x24e   :  { %v260_v57 = vmul.f32 %v2495_v46, %v258_v56 }
 0x250   :  { %267 = vrot.lane.b32.xlu0 %v260_v57, %s2685_s1 }
 0x251   :  { %v263_v58 = vpop.permute.xlu1 %262 }
 0x252   :  { %265 = vst.msk [vmem:[#allocation5] sm:$0xff] %vm79_vm0, %v263_v58 }
 0x259   :  { %v342_v59 = vld [vmem:[#allocation5] sm:$0xff] }
 0x25a   :  { %344 = vrot.lane.b32.xlu1 %v342_v59, %s2685_s1 }
 0x2c2   :  { %v268_v60 = vpop.permute.xlu0 %267 }
 0x2c3   :  { %270 = vst.msk [vmem:[#allocation4] sm:$0xff] %vm79_vm0, %v268_v60  ;;  %271 = vst.msk [vmem:[#allocation3] sm:$0xff] %vm79_vm0, %v268_v60 }
 0x2ca   :  { %v273_v61 = vld [vmem:[#allocation4] sm:$0xff] }
 0x2cb   :  { %v274_v62 = vpack.c.bf16 %v273_v61, %v273_v61 }
 0x2cc   :  { %v345_v13 = vpop.permute.xlu1 %344 }
 0x2cd   :  { %2299 = vmatmul.mubr.msk.bf16.vlgmr.msra.gmra.mxu1 %vm79_vm0, %v274_v62 }
 0x2ce   :  { %2314 = vmatprep.mubr.msk.bf16.mxu1 %vm2683_vm1, %v2682_v16  ;;  %2311 = vmatpush3.bf16.msra.mxu1 %v2460_v50 }
 0x2cf   :  { %2312 = vmatprep.subr.bf16.mxu1 %v2682_v16 }
 0x2d2   :  { %2313 = vmatpush3.bf16.msra.mxu1 %v2461_v51 }
 0x2d3   :  { %2326 = vmatprep.subr.bf16.mxu1 %v2682_v16 }
 0x38d   :  { %v328_v1 = vpop.f32.mrf.mxu1 }
 0x38e   :  { %v334_v2 = vadd.f32 %v328_v1, %v130_v0 }
 0x38f   :  { %v2300_v3 = vpop.f32.mrf.mxu1 }
 0x390   :  { %2498 = vtanh.f32 %v334_v2  ;;  %v2135_v7 = vmul.f32 -1.442695, %v334_v2 }
 0x391   :  { %v331_v4 = vpop.f32.mrf.mxu1 }
 0x392   :  { %2500 = vpow2.f32 %v2135_v7 }
 0x393   :  { %v2301_v5 = vpop.f32.mrf.mxu1 }
 0x39d   :  { %v2499_v6 = vpop.eup %2498 }
 0x39e   :  { %349 = vrot.lane.b32.xlu0 %v2499_v6, %s2684_s3 }
 0x39f   :  { %v2501_v8 = vpop.eup %2500 }
 0x3a0   :  { %v338_v9 = vadd.f32 1.0, %v2501_v8 }
 0x3a2   :  { %2502 = vrcp.f32 %v338_v9 }
 0x3af   :  { %v2503_v10 = vpop.eup %2502 }
 0x3b0   :  { %v347_v14 = vmul.f32 %v2503_v10, %v345_v13 }
 0x410   :  { %v350_v11 = vpop.permute.xlu0 %349 }
 0x411   :  { %v352_v12 = vmul.f32 %v2503_v10, %v350_v11  ;;  %v2462_v11 = vld [vmem:[%s3259_s2 + $0x8] sm:$0xff]  }
 0x413   :  { %354 = vrot.lane.b32.xlu0 %v352_v12, %s2685_s1  ;;  %v2463_v12 = vld [vmem:[%s3259_s2] sm:$0xff]  }
 0x485   :  { %v355_v15 = vpop.permute.xlu0 %354 }
 0x486   :  { %v357_v17 = vadd.f32 %v355_v15, %v347_v14 }
 0x488   :  { %2504 = vtanh.f32 %v357_v17 }
 0x495   :  { %v2505_v18 = vpop.eup %2504 }
 0x496   :  { %360 = vrot.lane.b32.xlu1 %v2505_v18, %s2684_s3 }
 0x49a   :  { %365 = vrot.lane.b32.xlu1 %v357_v17, %s2686_s19 }
 0x508   :  { %v361_v21 = vpop.permute.xlu1 %360 }
 0x509   :  { %v363_v22 = vmul.f32 %v2503_v10, %v361_v21 }
 0x50b   :  { %370 = vrot.lane.b32.xlu0 %v363_v22, %s2685_s1 }
 0x50c   :  { %v366_v23 = vpop.permute.xlu1 %365 }
 0x50d   :  { %368 = vst.msk [vmem:[#allocation5] sm:$0xff] %vm79_vm0, %v366_v23 }
 0x514   :  { %v445_v26 = vld [vmem:[#allocation5] sm:$0xff] }
 0x515   :  { %447 = vrot.lane.b32.xlu1 %v445_v26, %s2685_s1 }
 0x57d   :  { %v371_v27 = vpop.permute.xlu0 %370 }
 0x57e   :  { %373 = vst.msk [vmem:[#allocation4] sm:$0xff] %vm79_vm0, %v371_v27  ;;  %374 = vst.msk [vmem:[#allocation3 + $0x8] sm:$0xff] %vm79_vm0, %v371_v27 }
 0x585   :  { %v376_v29 = vld [vmem:[#allocation4] sm:$0xff] }
 0x586   :  { %v377_v30 = vpack.c.bf16 %v376_v29, %v376_v29 }
 0x587   :  { %v448_v46 = vpop.permute.xlu1 %447 }
 0x588   :  { %2307 = vmatmul.mubr.msk.bf16.vlgmr.msra.gmra.mxu0 %vm79_vm0, %v377_v30 }
 0x589   :  { %2322 = vmatprep.mubr.msk.bf16.mxu0 %vm2683_vm1, %v2682_v16  ;;  %2319 = vmatpush3.bf16.msra.mxu0 %v2462_v11 }
 0x58a   :  { %2320 = vmatprep.subr.bf16.mxu0 %v2682_v16 }
 0x58d   :  { %2321 = vmatpush3.bf16.msra.mxu0 %v2463_v12 }
 0x58e   :  { %2334 = vmatprep.subr.bf16.mxu0 %v2682_v16 }
 0x648   :  { %v431_v33 = vpop.f32.mrf.mxu0 }
 0x649   :  { %v437_v34 = vadd.f32 %v431_v33, %v2827_v24 }
 0x64a   :  { %v2308_v36 = vpop.f32.mrf.mxu0 }
 0x64b   :  { %2506 = vtanh.f32 %v437_v34  ;;  %v2139_v40 = vmul.f32 -1.442695, %v437_v34 }
 0x64c   :  { %v434_v37 = vpop.f32.mrf.mxu0 }
 0x64d   :  { %2508 = vpow2.f32 %v2139_v40 }
 0x64e   :  { %v2309_v38 = vpop.f32.mrf.mxu0 }
 0x658   :  { %v2507_v39 = vpop.eup %2506 }
 0x659   :  { %452 = vrot.lane.b32.xlu0 %v2507_v39, %s2684_s3 }
 0x65a   :  { %v2509_v41 = vpop.eup %2508 }
 0x65b   :  { %v441_v42 = vadd.f32 1.0, %v2509_v41 }
 0x65d   :  { %2510 = vrcp.f32 %v441_v42 }
 0x66a   :  { %v2511_v43 = vpop.eup %2510 }
 0x66b   :  { %v450_v47 = vmul.f32 %v2511_v43, %v448_v46 }
 0x6cb   :  { %v453_v44 = vpop.permute.xlu0 %452 }
 0x6cc   :  { %v455_v45 = vmul.f32 %v2511_v43, %v453_v44  ;;  %v2465_v44 = vld [vmem:[%s3259_s2] sm:$0xff]  }
 0x6ce   :  { %457 = vrot.lane.b32.xlu0 %v455_v45, %s2685_s1 }
 0x740   :  { %v458_v24 = vpop.permute.xlu0 %457 }
 0x741   :  { %v460_v48 = vadd.f32 %v458_v24, %v450_v47 }
 0x743   :  { %2512 = vtanh.f32 %v460_v48 }
 0x750   :  { %v2513_v49 = vpop.eup %2512 }
 0x751   :  { %463 = vrot.lane.b32.xlu1 %v2513_v49, %s2684_s3 }
 0x755   :  { %468 = vrot.lane.b32.xlu1 %v460_v48, %s2686_s19 }
 0x7c3   :  { %v464_v52 = vpop.permute.xlu1 %463 }
 0x7c4   :  { %v466_v53 = vmul.f32 %v2511_v43, %v464_v52  ;;  %v2464_v43 = vld [vmem:[%s3259_s2 + $0x8] sm:$0xff]  }
 0x7c6   :  { %473 = vrot.lane.b32.xlu0 %v466_v53, %s2685_s1 }
 0x7c7   :  { %v469_v54 = vpop.permute.xlu1 %468 }
 0x7c8   :  { %471 = vst.msk [vmem:[#allocation5] sm:$0xff] %vm79_vm0, %v469_v54 }
 0x7cf   :  { %v548_v55 = vld [vmem:[#allocation5] sm:$0xff] }
 0x7d0   :  { %550 = vrot.lane.b32.xlu1 %v548_v55, %s2685_s1 }
 0x838   :  { %v474_v56 = vpop.permute.xlu0 %473 }
 0x839   :  { %476 = vst.msk [vmem:[#allocation4] sm:$0xff] %vm79_vm0, %v474_v56  ;;  %477 = vst.msk [vmem:[#allocation3 + $0x10] sm:$0xff] %vm79_vm0, %v474_v56 }
 0x840   :  { %v479_v57 = vld [vmem:[#allocation4] sm:$0xff] }
 0x841   :  { %v480_v58 = vpack.c.bf16 %v479_v57, %v479_v57 }
 0x842   :  { %v551_v7 = vpop.permute.xlu1 %550 }
 0x843   :  { %2315 = vmatmul.mubr.msk.bf16.vlgmr.msra.gmra.mxu1 %vm79_vm0, %v480_v58 }
 0x844   :  { %2330 = vmatprep.mubr.msk.bf16.mxu1 %vm2683_vm1, %v2682_v16  ;;  %2327 = vmatpush3.bf16.msra.mxu1 %v2464_v43 }
 0x845   :  { %2328 = vmatprep.subr.bf16.mxu1 %v2682_v16 }
 0x848   :  { %2329 = vmatpush3.bf16.msra.mxu1 %v2465_v44  ;;  %v2470_v44 = vld [vmem:[%s3259_s2 + $0x8] sm:$0xff]  }
 0x849   :  { %2342 = vmatprep.subr.bf16.mxu1 %v2682_v16 }
 0x903   :  { %v534_v59 = vpop.f32.mrf.mxu1 }
 0x904   :  { %v540_v60 = vadd.f32 %v534_v59, %v2836_v31 }
 0x905   :  { %v2316_v61 = vpop.f32.mrf.mxu1 }
 0x906   :  { %2514 = vtanh.f32 %v540_v60  ;;  %v2143_v1 = vmul.f32 -1.442695, %v540_v60 }
 0x907   :  { %v537_v62 = vpop.f32.mrf.mxu1 }
 0x908   :  { %2516 = vpow2.f32 %v2143_v1 }
 0x909   :  { %v2317_v63 = vpop.f32.mrf.mxu1 }
 0x913   :  { %v2515_v0 = vpop.eup %2514 }
 0x914   :  { %555 = vrot.lane.b32.xlu0 %v2515_v0, %s2684_s3 }
 0x915   :  { %v2517_v2 = vpop.eup %2516 }
 0x916   :  { %v544_v3 = vadd.f32 1.0, %v2517_v2 }
 0x918   :  { %2518 = vrcp.f32 %v544_v3  ;;  %v2466_v3 = vld [vmem:[%s3259_s2 + $0x8] sm:$0xff]  }
 0x925   :  { %v2519_v4 = vpop.eup %2518 }
 0x926   :  { %v553_v8 = vmul.f32 %v2519_v4, %v551_v7 }
 0x986   :  { %v556_v5 = vpop.permute.xlu0 %555 }
 0x987   :  { %v558_v6 = vmul.f32 %v2519_v4, %v556_v5  ;;  %v2468_v5 = vld [vmem:[%s3261_s4 + $0x8] sm:$0xff]  }
 0x989   :  { %560 = vrot.lane.b32.xlu0 %v558_v6, %s2685_s1 }
 0x9fb   :  { %v561_v31 = vpop.permute.xlu0 %560 }
 0x9fc   :  { %v563_v9 = vadd.f32 %v561_v31, %v553_v8 }
 0x9fe   :  { %2520 = vtanh.f32 %v563_v9 }
 0xa0b   :  { %v2521_v10 = vpop.eup %2520 }
 0xa0c   :  { %566 = vrot.lane.b32.xlu1 %v2521_v10, %s2684_s3  ;;  %v998_v10 = vld [vmem:[#allocation3 + $0x8] sm:$0xff] }
 0xa10   :  { %571 = vrot.lane.b32.xlu1 %v563_v9, %s2686_s19 }
 0xa7e   :  { %v567_v13 = vpop.permute.xlu1 %566 }
 0xa7f   :  { %v569_v14 = vmul.f32 %v2519_v4, %v567_v13  ;;  %v2467_v4 = vld [vmem:[%s3259_s2] sm:$0xff]  }
 0xa80   :  { %v997_v13 = vld [vmem:[#allocation3] sm:$0xff] }
 0xa81   :  { %576 = vrot.lane.b32.xlu0 %v569_v14, %s2685_s1  ;;  %v2469_v14 = vld [vmem:[%s3261_s4] sm:$0xff]  }
 0xa82   :  { %v572_v15 = vpop.permute.xlu1 %571 }
 0xa83   :  { %574 = vst.msk [vmem:[#allocation5] sm:$0xff] %vm79_vm0, %v572_v15  ;;  %v1005_v15 = vpack.c.bf16 %v998_v10, %v997_v13 }
 0xa8a   :  { %v651_v17 = vld [vmem:[#allocation5] sm:$0xff] }
 0xa8b   :  { %653 = vrot.lane.b32.xlu1 %v651_v17, %s2685_s1 }
 0xaf3   :  { %v577_v18 = vpop.permute.xlu0 %576 }
 0xaf4   :  { %579 = vst.msk [vmem:[#allocation4] sm:$0xff] %vm79_vm0, %v577_v18  ;;  %580 = vst.msk [vmem:[#allocation3 + $0x18] sm:$0xff] %vm79_vm0, %v577_v18 }
 0xafb   :  { %v582_v19 = vld [vmem:[#allocation4] sm:$0xff]  ;;  %v1000_v17 = vld [vmem:[#allocation3 + $0x18] sm:$0xff] }
 0xafc   :  { %v583_v20 = vpack.c.bf16 %v582_v19, %v582_v19  ;;  %v999_v19 = vld [vmem:[#allocation3 + $0x10] sm:$0xff] }
 0xafd   :  { %v654_v39 = vpop.permute.xlu1 %653 }
 0xafe   :  { %2323 = vmatmul.mubr.msk.bf16.vlgmr.msra.gmra.mxu0 %vm79_vm0, %v583_v20  ;;  %v1006_v20 = vpack.c.bf16 %v1000_v17, %v999_v19 }
 0xaff   :  { %2338 = vmatprep.mubr.msk.bf16.mxu0 %vm2683_vm1, %v2682_v16  ;;  %2335 = vmatpush3.bf16.msra.mxu0 %v2466_v3  ;;  %v2472_v3 = vld [vmem:[%s3262_s5 + $0x8] sm:$0xff]  }
 0xb00   :  { %2336 = vmatprep.subr.bf16.mxu0 %v2682_v16 }
 0xb03   :  { %2337 = vmatpush3.bf16.msra.mxu0 %v2467_v4 }
 0xb04   :  { %2350 = vmatprep.subr.bf16.mxu0 %v2468_v5 }
 0xbbe   :  { %v637_v21 = vpop.f32.mrf.mxu0 }
 0xbbf   :  { %v643_v22 = vadd.f32 %v637_v21, %v2833_v28 }
 0xbc0   :  { %v2324_v23 = vpop.f32.mrf.mxu0 }
 0xbc1   :  { %2522 = vtanh.f32 %v643_v22  ;;  %v2147_v30 = vmul.f32 -1.442695, %v643_v22 }
 0xbc2   :  { %v640_v26 = vpop.f32.mrf.mxu0 }
 0xbc3   :  { %2524 = vpow2.f32 %v2147_v30 }
 0xbc4   :  { %v2325_v27 = vpop.f32.mrf.mxu0 }
 0xbce   :  { %v2523_v29 = vpop.eup %2522 }
 0xbcf   :  { %658 = vrot.lane.b32.xlu0 %v2523_v29, %s2684_s3 }
 0xbd0   :  { %v2525_v33 = vpop.eup %2524 }
 0xbd1   :  { %v647_v34 = vadd.f32 1.0, %v2525_v33 }
 0xbd3   :  { %2526 = vrcp.f32 %v647_v34 }
 0xbe0   :  { %v2527_v36 = vpop.eup %2526 }
 0xbe1   :  { %v656_v40 = vmul.f32 %v2527_v36, %v654_v39 }
 0xc41   :  { %v659_v37 = vpop.permute.xlu0 %658 }
 0xc42   :  { %v661_v38 = vmul.f32 %v2527_v36, %v659_v37 }
 0xc44   :  { %663 = vrot.lane.b32.xlu0 %v661_v38, %s2685_s1 }
 0xcb6   :  { %v664_v28 = vpop.permute.xlu0 %663 }
 0xcb7   :  { %v666_v41 = vadd.f32 %v664_v28, %v656_v40 }
 0xcb9   :  { %2528 = vtanh.f32 %v666_v41 }
 0xcc6   :  { %v2529_v42 = vpop.eup %2528 }
 0xcc7   :  { %669 = vrot.lane.b32.xlu1 %v2529_v42, %s2684_s3 }
 0xccb   :  { %674 = vrot.lane.b32.xlu1 %v666_v41, %s2686_s19 }
 0xd39   :  { %v670_v45 = vpop.permute.xlu1 %669 }
 0xd3a   :  { %v672_v46 = vmul.f32 %v2527_v36, %v670_v45  ;;  %v2471_v45 = vld [vmem:[%s3259_s2] sm:$0xff]  }
 0xd3c   :  { %679 = vrot.lane.b32.xlu0 %v672_v46, %s2685_s1 }
 0xd3d   :  { %v675_v47 = vpop.permute.xlu1 %674 }
 0xd3e   :  { %677 = vst.msk [vmem:[#allocation5] sm:$0xff] %vm79_vm0, %v675_v47 }
 0xd45   :  { %v754_v24 = vld [vmem:[#allocation5] sm:$0xff] }
 0xd46   :  { %756 = vrot.lane.b32.xlu1 %v754_v24, %s2685_s1 }
 0xdae   :  { %v680_v48 = vpop.permute.xlu0 %679 }
 0xdaf   :  { %682 = vst.msk [vmem:[#allocation4] sm:$0xff] %vm79_vm0, %v680_v48  ;;  %683 = vst.msk [vmem:[#allocation3 + $0x20] sm:$0xff] %vm79_vm0, %v680_v48 }
 0xdb6   :  { %v685_v49 = vld [vmem:[#allocation4] sm:$0xff] }
 0xdb7   :  { %v686_v50 = vpack.c.bf16 %v685_v49, %v685_v49  ;;  %v1001_v21 = vld [vmem:[#allocation3 + $0x20] sm:$0xff] }
 0xdb8   :  { %v757_v63 = vpop.permute.xlu1 %756 }
 0xdb9   :  { %2331 = vmatmul.mubr.msk.bf16.vlgmr.msra.gmra.mxu1 %vm79_vm0, %v686_v50 }
 0xdba   :  { %2346 = vmatprep.mubr.msk.bf16.mxu1 %vm2683_vm1, %v2682_v16  ;;  %2343 = vmatpush3.bf16.msra.mxu1 %v2470_v44  ;;  %v2474_v44 = vld [vmem:[%s3262_s5 + $0x8] sm:$0xff]  }
 0xdbb   :  { %2344 = vmatprep.subr.bf16.mxu1 %v2682_v16 }
 0xdbe   :  { %2345 = vmatpush3.bf16.msra.mxu1 %v2471_v45  ;;  %v2475_v45 = vld [vmem:[%s3262_s5] sm:$0xff]  }
 0xdbf   :  { %2362 = vmatprep.subr.bf16.mxu1 %v2682_v16 }
 0xe79   :  { %v740_v51 = vpop.f32.mrf.mxu1 }
 0xe7a   :  { %v746_v52 = vadd.f32 %v740_v51, %v2843_v35 }
 0xe7b   :  { %v2332_v53 = vpop.f32.mrf.mxu1 }
 0xe7c   :  { %2530 = vtanh.f32 %v746_v52  ;;  %v2151_v57 = vmul.f32 -1.442695, %v746_v52 }
 0xe7d   :  { %v743_v54 = vpop.f32.mrf.mxu1 }
 0xe7e   :  { %2532 = vpow2.f32 %v2151_v57 }
 0xe7f   :  { %v2333_v55 = vpop.f32.mrf.mxu1 }
 0xe89   :  { %v2531_v56 = vpop.eup %2530 }
 0xe8a   :  { %761 = vrot.lane.b32.xlu0 %v2531_v56, %s2684_s3 }
 0xe8b   :  { %v2533_v58 = vpop.eup %2532 }
 0xe8c   :  { %v750_v59 = vadd.f32 1.0, %v2533_v58 }
 0xe8e   :  { %2534 = vrcp.f32 %v750_v59 }
 0xe9b   :  { %v2535_v60 = vpop.eup %2534 }
 0xe9c   :  { %v759_v0 = vmul.f32 %v2535_v60, %v757_v63 }
 0xefc   :  { %v762_v61 = vpop.permute.xlu0 %761 }
 0xefd   :  { %v764_v62 = vmul.f32 %v2535_v60, %v762_v61 }
 0xeff   :  { %766 = vrot.lane.b32.xlu0 %v764_v62, %s2685_s1 }
 0xf71   :  { %v767_v35 = vpop.permute.xlu0 %766 }
 0xf72   :  { %v769_v1 = vadd.f32 %v767_v35, %v759_v0 }
 0xf74   :  { %2536 = vtanh.f32 %v769_v1 }
 0xf81   :  { %v2537_v2 = vpop.eup %2536 }
 0xf82   :  { %772 = vrot.lane.b32.xlu1 %v2537_v2, %s2684_s3 }
 0xf86   :  { %777 = vrot.lane.b32.xlu1 %v769_v1, %s2686_s19 }
 0xff4   :  { %v773_v6 = vpop.permute.xlu1 %772 }
 0xff5   :  { %v775_v7 = vmul.f32 %v2535_v60, %v773_v6  ;;  %v2473_v6 = vld [vmem:[%s3262_s5] sm:$0xff]  }
 0xff7   :  { %782 = vrot.lane.b32.xlu0 %v775_v7, %s2685_s1 }
 0xff8   :  { %v778_v8 = vpop.permute.xlu1 %777 }
 0xff9   :  { %780 = vst.msk [vmem:[#allocation5] sm:$0xff] %vm79_vm0, %v778_v8  ;;  %v2168_v8 = vld [vmem:[%s3267_s10 + $0x8] sm:$0xff] }
0x1000   :  { %v857_v31 = vld [vmem:[#allocation5] sm:$0xff] }
0x1001   :  { %859 = vrot.lane.b32.xlu1 %v857_v31, %s2685_s1 }
0x1069   :  { %v783_v9 = vpop.permute.xlu0 %782 }
0x106a   :  { %785 = vst.msk [vmem:[#allocation4] sm:$0xff] %vm79_vm0, %v783_v9  ;;  %786 = vst.msk [vmem:[#allocation3 + $0x28] sm:$0xff] %vm79_vm0, %v783_v9 }
0x1071   :  { %v788_v11 = vld [vmem:[#allocation4] sm:$0xff]  ;;  %v1002_v18 = vld [vmem:[#allocation3 + $0x28] sm:$0xff] }
0x1072   :  { %v789_v12 = vpack.c.bf16 %v788_v11, %v788_v11  ;;  %v1007_v22 = vpack.c.bf16 %v1002_v18, %v1001_v21  ;;  %v2167_v11 = vld [vmem:[%s3266_s9 + $0x8] sm:$0xff]  ;;  %v3038_v21 = vld [vmem:[%s3263_s6] ss:$0 sm:$0xff] }
0x1073   :  { %v860_v28 = vpop.permute.xlu1 %859 }
0x1074   :  { %2339 = vmatmul.mubr.msk.bf16.vlgmr.msra.gmra.mxu0 %vm79_vm0, %v789_v12 }
0x1075   :  { %2351 = vmatpush3.bf16.msra.mxu0 %v2468_v5  ;;  %2354 = vmatprep.mubr.msk.bf16.mxu0 %vm79_vm0, %v1005_v15 }
0x1076   :  { %2352 = vmatprep.subr.bf16.mxu0 %v2469_v14 }
0x1079   :  { %2353 = vmatpush3.bf16.msra.mxu0 %v2469_v14 }
0x107a   :  { %2378 = vmatprep.subr.bf16.mxu0 %v2682_v16 }
0x107c   :  { %2355 = vmatmul.mubr.msk.bf16.vlgmr.msra.gmra.mxu0 %vm79_vm0, %v1006_v20 }
0x107d   :  { %2358 = vmatprep.mubr.msk.bf16.mxu0 %vm79_vm0, %v1007_v22 }
0x1134   :  { %v843_v23 = vpop.f32.mrf.mxu0 }
0x1135   :  { %v849_v26 = vadd.f32 %v843_v23, %v2830_v25 }
0x1136   :  { %v2340_v27 = vpop.f32.mrf.mxu0 }
0x1137   :  { %2538 = vtanh.f32 %v849_v26  ;;  %v2155_v34 = vmul.f32 -1.442695, %v849_v26 }
0x1138   :  { %v846_v29 = vpop.f32.mrf.mxu0 }
0x1139   :  { %2540 = vpow2.f32 %v2155_v34 }
0x113a   :  { %v2341_v30 = vpop.f32.mrf.mxu0 }
0x113c   :  { %v3033_v19 = vpop.f32.mrf.mxu0 }
0x113e   :  { %v1078_v20 = vpop.f32.mrf.mxu0 }
0x113f   :  { %v1079_v22 = vadd.f32 %v3038_v21, %v1078_v20  ;;  %v1087_v20 = vadd.f32 %v3033_v19, %v3038_v21 }
0x1144   :  { %v2539_v33 = vpop.eup %2538 }
0x1145   :  { %864 = vrot.lane.b32.xlu0 %v2539_v33, %s2684_s3 }
0x1146   :  { %v2541_v36 = vpop.eup %2540 }
0x1147   :  { %v853_v37 = vadd.f32 1.0, %v2541_v36 }
0x1149   :  { %2542 = vrcp.f32 %v853_v37 }
0x1156   :  { %v2543_v38 = vpop.eup %2542 }
0x1157   :  { %v862_v41 = vmul.f32 %v2543_v38, %v860_v28 }
0x11b7   :  { %v865_v39 = vpop.permute.xlu0 %864 }
0x11b8   :  { %v867_v40 = vmul.f32 %v2543_v38, %v865_v39 }
0x11ba   :  { %869 = vrot.lane.b32.xlu0 %v867_v40, %s2685_s1 }
0x122c   :  { %v870_v25 = vpop.permute.xlu0 %869 }
0x122d   :  { %v872_v42 = vadd.f32 %v870_v25, %v862_v41 }
0x122f   :  { %2544 = vtanh.f32 %v872_v42 }
0x123c   :  { %v2545_v43 = vpop.eup %2544 }
0x123d   :  { %875 = vrot.lane.b32.xlu1 %v2545_v43, %s2684_s3 }
0x1241   :  { %880 = vrot.lane.b32.xlu1 %v872_v42, %s2686_s19 }
0x12af   :  { %v876_v46 = vpop.permute.xlu1 %875 }
0x12b0   :  { %v878_v47 = vmul.f32 %v2543_v38, %v876_v46 }
0x12b2   :  { %885 = vrot.lane.b32.xlu0 %v878_v47, %s2685_s1 }
0x12b3   :  { %v881_v24 = vpop.permute.xlu1 %880 }
0x12b4   :  { %883 = vst.msk [vmem:[#allocation5] sm:$0xff] %vm79_vm0, %v881_v24 }
0x12bb   :  { %v960_v48 = vld [vmem:[#allocation5] sm:$0xff] }
0x12bc   :  { %962 = vrot.lane.b32.xlu1 %v960_v48, %s2685_s1 }
0x1324   :  { %v886_v49 = vpop.permute.xlu0 %885 }
0x1325   :  { %888 = vst.msk [vmem:[#allocation4] sm:$0xff] %vm79_vm0, %v886_v49  ;;  %889 = vst.msk [vmem:[#allocation3 + $0x30] sm:$0xff] %vm79_vm0, %v886_v49 }
0x132c   :  { %v891_v50 = vld [vmem:[#allocation4] sm:$0xff]  ;;  %v1003_v13 = vld [vmem:[#allocation3 + $0x30] sm:$0xff] }
0x132d   :  { %v892_v51 = vpack.c.bf16 %v891_v50, %v891_v50 }
0x132e   :  { %v963_v0 = vpop.permute.xlu1 %962 }
0x132f   :  { %2347 = vmatmul.mubr.msk.bf16.vlgmr.msra.gmra.mxu1 %vm79_vm0, %v892_v51 }
0x1330   :  { %2366 = vmatprep.mubr.msk.bf16.mxu1 %vm2683_vm1, %v2682_v16  ;;  %2363 = vmatpush3.bf16.msra.mxu1 %v2472_v3 }
0x1331   :  { %2364 = vmatprep.subr.bf16.mxu1 %v2682_v16 }
0x1334   :  { %2365 = vmatpush3.bf16.msra.mxu1 %v2473_v6  ;;  %v2476_v6 = vld [vmem:[%s3262_s5 + $0x8] sm:$0xff]  }
0x1335   :  { %2370 = vmatprep.subr.bf16.mxu1 %v2682_v16  ;;  %2379 = vmatpush3.bf16.msra.mxu0 %v2476_v6 }
0x1336   :  { %2380 = vmatprep.subr.bf16.mxu0 %v2682_v16 }
0x13ef   :  { %v946_v52 = vpop.f32.mrf.mxu1 }
0x13f0   :  { %v952_v53 = vadd.f32 %v946_v52, %v2839_v32  ;;  %v3061_v52 = vpop.f32.mrf.mxu0 }
0x13f1   :  { %v2348_v54 = vpop.f32.mrf.mxu1 }
0x13f2   :  { %2546 = vtanh.f32 %v952_v53  ;;  %v2159_v58 = vmul.f32 -1.442695, %v952_v53  ;;  %v1081_v53 = vpop.f32.mrf.mxu0 }
0x13f3   :  { %v949_v55 = vpop.f32.mrf.mxu1  ;;  %v1082_v54 = vadd.f32 %v3038_v21, %v1081_v53 }
0x13f4   :  { %2548 = vpow2.f32 %v2159_v58 }
0x13f5   :  { %v2349_v56 = vpop.f32.mrf.mxu1 }
0x13ff   :  { %v2547_v57 = vpop.eup %2546 }
0x1400   :  { %967 = vrot.lane.b32.xlu0 %v2547_v57, %s2684_s3 }
0x1401   :  { %v2549_v59 = vpop.eup %2548 }
0x1402   :  { %v956_v60 = vadd.f32 1.0, %v2549_v59 }
0x1404   :  { %2550 = vrcp.f32 %v956_v60 }
0x1411   :  { %v2551_v61 = vpop.eup %2550 }
0x1412   :  { %v965_v35 = vmul.f32 %v2551_v61, %v963_v0 }
0x1472   :  { %v968_v62 = vpop.permute.xlu0 %967 }
0x1473   :  { %v970_v63 = vmul.f32 %v2551_v61, %v968_v62 }
0x1475   :  { %972 = vrot.lane.b32.xlu0 %v970_v63, %s2685_s1 }
0x14e7   :  { %v973_v32 = vpop.permute.xlu0 %972 }
0x14e8   :  { %v975_v1 = vadd.f32 %v973_v32, %v965_v35 }
0x14ea   :  { %2552 = vtanh.f32 %v975_v1 }
0x14f7   :  { %v2553_v2 = vpop.eup %2552 }
0x14f8   :  { %978 = vrot.lane.b32.xlu1 %v2553_v2, %s2684_s3 }
0x14fc   :  { %983 = vrot.lane.b32.xlu1 %v975_v1, %s2686_s19 }
0x156a   :  { %v979_v4 = vpop.permute.xlu1 %978 }
0x156b   :  { %v981_v5 = vmul.f32 %v2551_v61, %v979_v4 }
0x156d   :  { %988 = vrot.lane.b32.xlu0 %v981_v5, %s2685_s1 }
0x156e   :  { %v984_v7 = vpop.permute.xlu1 %983 }
0x156f   :  { %986 = vst.msk [vmem:[#allocation5] sm:$0xff] %vm79_vm0, %v984_v7  ;;  %v2477_v7 = vld [vmem:[%s3262_s5] sm:$0xff]  }
0x1570   :  { %2381 = vmatpush3.bf16.msra.mxu0 %v2477_v7 }
0x1571   :  { %2394 = vmatprep.subr.bf16.mxu0 %v2682_v16 }
0x1576   :  { %v995_v31 = vld [vmem:[#allocation5] sm:$0xff] }
0x1577   :  { %1122 = vst.msk [vmem:[#allocation5] sm:$0xff] %vm79_vm0, %v2168_v8  ;;  %996 = vst.msk [vmem:[#allocation10] sm:$0xff] %vm79_vm0, %v995_v31 }
0x157e   :  { %v1193_v9 = vld [vmem:[#allocation5] sm:$0xff] }
0x157f   :  { %1195 = vrot.lane.b32.xlu1 %v1193_v9, %s2685_s1 }
0x15df   :  { %v989_v10 = vpop.permute.xlu0 %988 }
0x15e0   :  { %991 = vst.msk [vmem:[#allocation4] sm:$0xff] %vm79_vm0, %v989_v10  ;;  %992 = vst.msk [vmem:[#allocation3 + $0x38] sm:$0xff] %vm79_vm0, %v989_v10 }
0x15e7   :  { %v993_v12 = vld [vmem:[#allocation4] sm:$0xff]  ;;  %v1004_v14 = vld [vmem:[#allocation3 + $0x38] sm:$0xff] }
0x15e8   :  { %1119 = vst.msk [vmem:[#allocation4] sm:$0xff] %vm79_vm0, %v2167_v11  ;;  %994 = vst.msk [vmem:[#allocation8] sm:$0xff] %vm79_vm0, %v993_v12  ;;  %v1008_v15 = vpack.c.bf16 %v1004_v14, %v1003_v13 }
0x15ea   :  { %2359 = vmatmul.mubr.msk.bf16.gmra.mxu0 %vm79_vm0, %v1008_v15 }
0x15eb   :  { %2382 = vmatprep.mubr.msk.bf16.mxu0 %vm2683_vm1, %v2682_v16 }
0x15ef   :  { %v1124_v17 = vld [vmem:[#allocation4] sm:$0xff] }
0x15f0   :  { %v1125_v18 = vpack.c.bf16 %v1124_v17, %v1124_v17 }
0x15f1   :  { %v1196_v28 = vpop.permute.xlu1 %1195 }
0x15f2   :  { %2367 = vmatmul.mubr.msk.bf16.vlgmr.msra.gmra.mxu1 %vm79_vm0, %v1125_v18 }
0x15f3   :  { %2374 = vmatprep.mubr.msk.bf16.mxu1 %vm2683_vm1, %v2682_v16  ;;  %2371 = vmatpush3.bf16.msra.mxu1 %v2474_v44 }
0x15f4   :  { %2372 = vmatprep.subr.bf16.mxu1 %v2682_v16 }
0x15f7   :  { %2373 = vmatpush3.bf16.msra.mxu1 %v2475_v45 }
0x15f8   :  { %2386 = vmatprep.subr.bf16.mxu1 %v2682_v16 }
0x16aa   :  { %v3084_v14 = vpop.f32.mrf.mxu0 }
0x16ac   :  { %v3086_v15 = vpop.f32.mrf.mxu0 }
0x16ae   :  { %v3088_v17 = vpop.f32.mrf.mxu0 }
0x16b0   :  { %v3090_v18 = vpop.f32.mrf.mxu0 }
0x16b2   :  { %v1179_v23 = vpop.f32.mrf.mxu1 }
0x16b3   :  { %v1185_v26 = vadd.f32 %v1179_v23, %v1079_v22 }
0x16b4   :  { %v2368_v27 = vpop.f32.mrf.mxu1 }
0x16b5   :  { %2554 = vtanh.f32 %v1185_v26  ;;  %v2172_v34 = vmul.f32 -1.442695, %v1185_v26 }
0x16b6   :  { %v1182_v29 = vpop.f32.mrf.mxu1 }
0x16b7   :  { %2556 = vpow2.f32 %v2172_v34 }
0x16b8   :  { %v2369_v30 = vpop.f32.mrf.mxu1 }
0x16c2   :  { %v2555_v33 = vpop.eup %2554 }
0x16c3   :  { %1200 = vrot.lane.b32.xlu0 %v2555_v33, %s2684_s3 }
0x16c4   :  { %v2557_v36 = vpop.eup %2556 }
0x16c5   :  { %v1189_v37 = vadd.f32 1.0, %v2557_v36 }
0x16c7   :  { %2558 = vrcp.f32 %v1189_v37 }
0x16d4   :  { %v2559_v38 = vpop.eup %2558 }
0x16d5   :  { %v1198_v41 = vmul.f32 %v2559_v38, %v1196_v28 }
0x1735   :  { %v1201_v39 = vpop.permute.xlu0 %1200 }
0x1736   :  { %v1203_v40 = vmul.f32 %v2559_v38, %v1201_v39 }
0x1738   :  { %1205 = vrot.lane.b32.xlu0 %v1203_v40, %s2685_s1 }
0x17aa   :  { %v1206_v25 = vpop.permute.xlu0 %1205 }
0x17ab   :  { %v1208_v42 = vadd.f32 %v1206_v25, %v1198_v41 }
0x17ad   :  { %2560 = vtanh.f32 %v1208_v42 }
0x17ba   :  { %v2561_v43 = vpop.eup %2560 }
0x17bb   :  { %1211 = vrot.lane.b32.xlu1 %v2561_v43, %s2684_s3  ;;  %v2479_v43 = vld [vmem:[%s3262_s5] sm:$0xff]  }
0x17bf   :  { %1216 = vrot.lane.b32.xlu1 %v1208_v42, %s2686_s19  ;;  %v2478_v42 = vld [vmem:[%s3262_s5 + $0x8] sm:$0xff]  }
0x182d   :  { %v1212_v46 = vpop.permute.xlu1 %1211 }
0x182e   :  { %v1214_v47 = vmul.f32 %v2559_v38, %v1212_v46 }
0x1830   :  { %1221 = vrot.lane.b32.xlu0 %v1214_v47, %s2685_s1 }
0x1831   :  { %v1217_v24 = vpop.permute.xlu1 %1216 }
0x1832   :  { %1219 = vst.msk [vmem:[#allocation5] sm:$0xff] %vm79_vm0, %v1217_v24 }
0x1839   :  { %v1296_v48 = vld [vmem:[#allocation5] sm:$0xff] }
0x183a   :  { %1298 = vrot.lane.b32.xlu1 %v1296_v48, %s2685_s1 }
0x18a2   :  { %v1222_v49 = vpop.permute.xlu0 %1221 }
0x18a3   :  { %1224 = vst.msk [vmem:[#allocation4] sm:$0xff] %vm79_vm0, %v1222_v49  ;;  %1225 = vst.msk [vmem:[#allocation3] sm:$0xff] %vm79_vm0, %v1222_v49 }
0x18aa   :  { %v1227_v50 = vld [vmem:[#allocation4] sm:$0xff] }
0x18ab   :  { %v1228_v51 = vpack.c.bf16 %v1227_v50, %v1227_v50  ;;  %v1090_v50 = vadd.f32 %v3061_v52, %v3038_v21 }
0x18ac   :  { %v1299_v1 = vpop.permute.xlu1 %1298 }
0x18ad   :  { %2375 = vmatmul.mubr.msk.bf16.vlgmr.msra.gmra.mxu1 %vm79_vm0, %v1228_v51 }
0x18ae   :  { %2390 = vmatprep.mubr.msk.bf16.mxu1 %vm2683_vm1, %v2682_v16  ;;  %2387 = vmatpush3.bf16.msra.mxu1 %v2478_v42 }
0x18af   :  { %2388 = vmatprep.subr.bf16.mxu1 %v2682_v16 }
0x18b2   :  { %2389 = vmatpush3.bf16.msra.mxu1 %v2479_v43 }
0x18b3   :  { %2402 = vmatprep.subr.bf16.mxu1 %v2682_v16 }
0x196d   :  { %v1282_v55 = vpop.f32.mrf.mxu1 }
0x196e   :  { %v1288_v56 = vadd.f32 %v1282_v55, %v1082_v54 }
0x196f   :  { %v2376_v57 = vpop.f32.mrf.mxu1 }
0x1970   :  { %2562 = vtanh.f32 %v1288_v56  ;;  %v2176_v61 = vmul.f32 -1.442695, %v1288_v56 }
0x1971   :  { %v1285_v58 = vpop.f32.mrf.mxu1 }
0x1972   :  { %2564 = vpow2.f32 %v2176_v61 }
0x1973   :  { %v2377_v59 = vpop.f32.mrf.mxu1 }
0x197d   :  { %v2563_v60 = vpop.eup %2562 }
0x197e   :  { %1303 = vrot.lane.b32.xlu0 %v2563_v60, %s2684_s3 }
0x197f   :  { %v2565_v62 = vpop.eup %2564 }
0x1980   :  { %v1292_v63 = vadd.f32 1.0, %v2565_v62 }
0x1982   :  { %2566 = vrcp.f32 %v1292_v63 }
0x198f   :  { %v2567_v0 = vpop.eup %2566 }
0x1990   :  { %v1301_v2 = vmul.f32 %v2567_v0, %v1299_v1 }
0x19f0   :  { %v1304_v35 = vpop.permute.xlu0 %1303 }
0x19f1   :  { %v1306_v32 = vmul.f32 %v2567_v0, %v1304_v35 }
0x19f3   :  { %1308 = vrot.lane.b32.xlu0 %v1306_v32, %s2685_s1 }
0x1a65   :  { %v1309_v3 = vpop.permute.xlu0 %1308 }
0x1a66   :  { %v1311_v4 = vadd.f32 %v1309_v3, %v1301_v2  ;;  %v2480_v2 = vld [vmem:[%s3262_s5 + $0x8] sm:$0xff]   ;;  %v2481_v3 = vld [vmem:[%s3262_s5] sm:$0xff]  }
0x1a68   :  { %2568 = vtanh.f32 %v1311_v4 }
0x1a75   :  { %v2569_v5 = vpop.eup %2568 }
0x1a76   :  { %1314 = vrot.lane.b32.xlu1 %v2569_v5, %s2684_s3 }
0x1a7a   :  { %1319 = vrot.lane.b32.xlu1 %v1311_v4, %s2686_s19 }
0x1ae8   :  { %v1315_v8 = vpop.permute.xlu1 %1314 }
0x1ae9   :  { %v1317_v31 = vmul.f32 %v2567_v0, %v1315_v8 }
0x1aeb   :  { %1324 = vrot.lane.b32.xlu0 %v1317_v31, %s2685_s1 }
0x1aec   :  { %v1320_v9 = vpop.permute.xlu1 %1319 }
0x1aed   :  { %1322 = vst.msk [vmem:[#allocation5] sm:$0xff] %vm79_vm0, %v1320_v9 }
0x1af4   :  { %v1399_v10 = vld [vmem:[#allocation5] sm:$0xff] }
0x1af5   :  { %1401 = vrot.lane.b32.xlu1 %v1399_v10, %s2685_s1  ;;  %v1095_v10 = vadd.f32 %v3038_v21, %v3086_v15 }
0x1b5d   :  { %v1325_v11 = vpop.permute.xlu0 %1324 }
0x1b5e   :  { %1327 = vst.msk [vmem:[#allocation4] sm:$0xff] %vm79_vm0, %v1325_v11  ;;  %1328 = vst.msk [vmem:[#allocation3 + $0x8] sm:$0xff] %vm79_vm0, %v1325_v11 }
0x1b65   :  { %v1330_v12 = vld [vmem:[#allocation4] sm:$0xff] }
0x1b66   :  { %v1331_v13 = vpack.c.bf16 %v1330_v12, %v1330_v12 }
0x1b67   :  { %v1402_v19 = vpop.permute.xlu1 %1401 }
0x1b68   :  { %2383 = vmatmul.mubr.msk.bf16.vlgmr.msra.gmra.mxu0 %vm79_vm0, %v1331_v13 }
0x1b69   :  { %2398 = vmatprep.mubr.msk.bf16.mxu0 %vm2683_vm1, %v2682_v16  ;;  %2395 = vmatpush3.bf16.msra.mxu0 %v2480_v2 }
0x1b6a   :  { %2396 = vmatprep.subr.bf16.mxu0 %v2682_v16 }
0x1b6d   :  { %2397 = vmatpush3.bf16.msra.mxu0 %v2481_v3 }
0x1b6e   :  { %2410 = vmatprep.subr.bf16.mxu0 %v2682_v16 }
0x1c28   :  { %v1385_v22 = vpop.f32.mrf.mxu0 }
0x1c29   :  { %v1391_v23 = vadd.f32 %v1385_v22, %v1087_v20 }
0x1c2a   :  { %v2384_v26 = vpop.f32.mrf.mxu0 }
0x1c2b   :  { %2570 = vtanh.f32 %v1391_v23  ;;  %v2180_v33 = vmul.f32 -1.442695, %v1391_v23 }
0x1c2c   :  { %v1388_v27 = vpop.f32.mrf.mxu0 }
0x1c2d   :  { %2572 = vpow2.f32 %v2180_v33 }
0x1c2e   :  { %v2385_v29 = vpop.f32.mrf.mxu0 }
0x1c38   :  { %v2571_v30 = vpop.eup %2570 }
0x1c39   :  { %1406 = vrot.lane.b32.xlu0 %v2571_v30, %s2684_s3 }
0x1c3a   :  { %v2573_v34 = vpop.eup %2572 }
0x1c3b   :  { %v1395_v36 = vadd.f32 1.0, %v2573_v34 }
0x1c3d   :  { %2574 = vrcp.f32 %v1395_v36 }
0x1c4a   :  { %v2575_v37 = vpop.eup %2574 }
0x1c4b   :  { %v1404_v40 = vmul.f32 %v2575_v37, %v1402_v19  ;;  %v2482_v19 = vld [vmem:[%s3262_s5 + $0x8] sm:$0xff]  }
0x1cab   :  { %v1407_v38 = vpop.permute.xlu0 %1406 }
0x1cac   :  { %v1409_v39 = vmul.f32 %v2575_v37, %v1407_v38 }
0x1cae   :  { %1411 = vrot.lane.b32.xlu0 %v1409_v39, %s2685_s1 }
0x1d20   :  { %v1412_v28 = vpop.permute.xlu0 %1411 }
0x1d21   :  { %v1414_v41 = vadd.f32 %v1412_v28, %v1404_v40  ;;  %v2483_v40 = vld [vmem:[%s3262_s5] sm:$0xff]  }
0x1d23   :  { %2576 = vtanh.f32 %v1414_v41 }
0x1d30   :  { %v2577_v25 = vpop.eup %2576 }
0x1d31   :  { %1417 = vrot.lane.b32.xlu1 %v2577_v25, %s2684_s3 }
0x1d35   :  { %1422 = vrot.lane.b32.xlu1 %v1414_v41, %s2686_s19 }
0x1da3   :  { %v1418_v44 = vpop.permute.xlu1 %1417 }
0x1da4   :  { %v1420_v45 = vmul.f32 %v2575_v37, %v1418_v44 }
0x1da6   :  { %1427 = vrot.lane.b32.xlu0 %v1420_v45, %s2685_s1 }
0x1da7   :  { %v1423_v46 = vpop.permute.xlu1 %1422 }
0x1da8   :  { %1425 = vst.msk [vmem:[#allocation5] sm:$0xff] %vm79_vm0, %v1423_v46  ;;  %v1098_v46 = vadd.f32 %v3038_v21, %v3090_v18 }
0x1daf   :  { %v1502_v47 = vld [vmem:[#allocation5] sm:$0xff] }
0x1db0   :  { %1504 = vrot.lane.b32.xlu1 %v1502_v47, %s2685_s1 }
0x1e18   :  { %v1428_v24 = vpop.permute.xlu0 %1427 }
0x1e19   :  { %1430 = vst.msk [vmem:[#allocation4] sm:$0xff] %vm79_vm0, %v1428_v24  ;;  %1431 = vst.msk [vmem:[#allocation3 + $0x10] sm:$0xff] %vm79_vm0, %v1428_v24 }
0x1e20   :  { %v1433_v48 = vld [vmem:[#allocation4] sm:$0xff] }
0x1e21   :  { %v1434_v49 = vpack.c.bf16 %v1433_v48, %v1433_v48 }
0x1e22   :  { %v1505_v52 = vpop.permute.xlu1 %1504 }
0x1e23   :  { %2391 = vmatmul.mubr.msk.bf16.vlgmr.msra.gmra.mxu1 %vm79_vm0, %v1434_v49 }
0x1e24   :  { %2406 = vmatprep.mubr.msk.bf16.mxu1 %vm2683_vm1, %v2682_v16  ;;  %2403 = vmatpush3.bf16.msra.mxu1 %v2482_v19 }
0x1e25   :  { %2404 = vmatprep.subr.bf16.mxu1 %v2682_v16 }
0x1e28   :  { %2405 = vmatpush3.bf16.msra.mxu1 %v2483_v40 }
0x1e29   :  { %2418 = vmatprep.subr.bf16.mxu1 %v2682_v16 }
0x1ee3   :  { %v1488_v51 = vpop.f32.mrf.mxu1 }
0x1ee4   :  { %v1494_v53 = vadd.f32 %v1488_v51, %v1090_v50 }
0x1ee5   :  { %v2392_v54 = vpop.f32.mrf.mxu1 }
0x1ee6   :  { %2578 = vtanh.f32 %v1494_v53  ;;  %v2184_v58 = vmul.f32 -1.442695, %v1494_v53 }
0x1ee7   :  { %v1491_v55 = vpop.f32.mrf.mxu1 }
0x1ee8   :  { %2580 = vpow2.f32 %v2184_v58 }
0x1ee9   :  { %v2393_v56 = vpop.f32.mrf.mxu1 }
0x1ef3   :  { %v2579_v57 = vpop.eup %2578 }
0x1ef4   :  { %1509 = vrot.lane.b32.xlu0 %v2579_v57, %s2684_s3 }
0x1ef5   :  { %v2581_v59 = vpop.eup %2580 }
0x1ef6   :  { %v1498_v60 = vadd.f32 1.0, %v2581_v59 }
0x1ef8   :  { %2582 = vrcp.f32 %v1498_v60 }
0x1f05   :  { %v2583_v61 = vpop.eup %2582 }
0x1f06   :  { %v1507_v0 = vmul.f32 %v2583_v61, %v1505_v52  ;;  %v2485_v52 = vld [vmem:[%s3262_s5] sm:$0xff]  }
0x1f66   :  { %v1510_v62 = vpop.permute.xlu0 %1509 }
0x1f67   :  { %v1512_v63 = vmul.f32 %v2583_v61, %v1510_v62 }
0x1f69   :  { %1514 = vrot.lane.b32.xlu0 %v1512_v63, %s2685_s1  ;;  %v2484_v63 = vld [vmem:[%s3262_s5 + $0x8] sm:$0xff]  }
0x1fdb   :  { %v1515_v35 = vpop.permute.xlu0 %1514 }
0x1fdc   :  { %v1517_v32 = vadd.f32 %v1515_v35, %v1507_v0  ;;  %v2486_v0 = vld [vmem:[%s3264_s7 + $0x8] sm:$0xff]  }
0x1fde   :  { %2584 = vtanh.f32 %v1517_v32 }
0x1feb   :  { %v2585_v1 = vpop.eup %2584 }
0x1fec   :  { %1520 = vrot.lane.b32.xlu1 %v2585_v1, %s2684_s3 }
0x1ff0   :  { %1525 = vrot.lane.b32.xlu1 %v1517_v32, %s2686_s19 }
0x205e   :  { %v1521_v4 = vpop.permute.xlu1 %1520 }
0x205f   :  { %v1523_v5 = vmul.f32 %v2583_v61, %v1521_v4  ;;  %v1954_v4 = vld [vmem:[#allocation3 + $0x8] sm:$0xff] }
0x2061   :  { %1530 = vrot.lane.b32.xlu0 %v1523_v5, %s2685_s1 }
0x2062   :  { %v1526_v6 = vpop.permute.xlu1 %1525 }
0x2063   :  { %1528 = vst.msk [vmem:[#allocation5] sm:$0xff] %vm79_vm0, %v1526_v6 }
0x206a   :  { %v1605_v7 = vld [vmem:[#allocation5] sm:$0xff] }
0x206b   :  { %1607 = vrot.lane.b32.xlu1 %v1605_v7, %s2685_s1  ;;  %v1953_v7 = vld [vmem:[#allocation3] sm:$0xff] }
0x20d3   :  { %v1531_v8 = vpop.permute.xlu0 %1530 }
0x20d4   :  { %1533 = vst.msk [vmem:[#allocation4] sm:$0xff] %vm79_vm0, %v1531_v8  ;;  %1534 = vst.msk [vmem:[#allocation3 + $0x18] sm:$0xff] %vm79_vm0, %v1531_v8  ;;  %v2487_v8 = vld [vmem:[%s3264_s7] sm:$0xff]  }
0x20db   :  { %v1536_v31 = vld [vmem:[#allocation4] sm:$0xff] }
0x20dc   :  { %v1537_v9 = vpack.c.bf16 %v1536_v31, %v1536_v31  ;;  %v1961_v31 = vpack.c.bf16 %v1954_v4, %v1953_v7 }
0x20dd   :  { %v1608_v15 = vpop.permute.xlu1 %1607 }
0x20de   :  { %2399 = vmatmul.mubr.msk.bf16.vlgmr.msra.gmra.mxu0 %vm79_vm0, %v1537_v9  ;;  %v1956_v9 = vld [vmem:[#allocation3 + $0x18] sm:$0xff] }
0x20df   :  { %2414 = vmatprep.mubr.msk.bf16.mxu0 %vm2683_vm1, %v2682_v16  ;;  %2411 = vmatpush3.bf16.msra.mxu0 %v2484_v63 }
0x20e0   :  { %2412 = vmatprep.subr.bf16.mxu0 %v2682_v16 }
0x20e3   :  { %2413 = vmatpush3.bf16.msra.mxu0 %v2485_v52 }
0x20e4   :  { %2426 = vmatprep.subr.bf16.mxu0 %v2486_v0 }
0x219e   :  { %v1591_v11 = vpop.f32.mrf.mxu0 }
0x219f   :  { %v1597_v12 = vadd.f32 %v1591_v11, %v1095_v10  ;;  %v1955_v11 = vld [vmem:[#allocation3 + $0x10] sm:$0xff] }
0x21a0   :  { %v2400_v13 = vpop.f32.mrf.mxu0 }
0x21a1   :  { %2586 = vtanh.f32 %v1597_v12  ;;  %v2188_v26 = vmul.f32 -1.442695, %v1597_v12  ;;  %v1962_v12 = vpack.c.bf16 %v1956_v9, %v1955_v11 }
0x21a2   :  { %v1594_v20 = vpop.f32.mrf.mxu0 }
0x21a3   :  { %2588 = vpow2.f32 %v2188_v26 }
0x21a4   :  { %v2401_v22 = vpop.f32.mrf.mxu0 }
0x21a5   :  { %v1103_v22 = vadd.f32 %v3084_v14, %v3038_v21 }
0x21ae   :  { %v2587_v23 = vpop.eup %2586 }
0x21af   :  { %1612 = vrot.lane.b32.xlu0 %v2587_v23, %s2684_s3 }
0x21b0   :  { %v2589_v27 = vpop.eup %2588 }
0x21b1   :  { %v1601_v29 = vadd.f32 1.0, %v2589_v27 }
0x21b3   :  { %2590 = vrcp.f32 %v1601_v29 }
0x21c0   :  { %v2591_v30 = vpop.eup %2590 }
0x21c1   :  { %v1610_v36 = vmul.f32 %v2591_v30, %v1608_v15 }
0x2221   :  { %v1613_v33 = vpop.permute.xlu0 %1612 }
0x2222   :  { %v1615_v34 = vmul.f32 %v2591_v30, %v1613_v33  ;;  %v3191_v33 = vld [vmem:[%s3265_s8] ss:$0 sm:$0xff] }
0x2224   :  { %1617 = vrot.lane.b32.xlu0 %v1615_v34, %s2685_s1 }
0x2296   :  { %v1618_v37 = vpop.permute.xlu0 %1617 }
0x2297   :  { %v1620_v38 = vadd.f32 %v1618_v37, %v1610_v36 }
0x2299   :  { %2592 = vtanh.f32 %v1620_v38 }
0x22a6   :  { %v2593_v39 = vpop.eup %2592 }
0x22a7   :  { %1623 = vrot.lane.b32.xlu1 %v2593_v39, %s2684_s3 }
0x22ab   :  { %1628 = vrot.lane.b32.xlu1 %v1620_v38, %s2686_s19 }
0x2319   :  { %v1624_v28 = vpop.permute.xlu1 %1623 }
0x231a   :  { %v1626_v41 = vmul.f32 %v2591_v30, %v1624_v28 }
0x231c   :  { %1633 = vrot.lane.b32.xlu0 %v1626_v41, %s2685_s1 }
0x231d   :  { %v1629_v25 = vpop.permute.xlu1 %1628 }
0x231e   :  { %1631 = vst.msk [vmem:[#allocation5] sm:$0xff] %vm79_vm0, %v1629_v25 }
0x2325   :  { %v1708_v42 = vld [vmem:[#allocation5] sm:$0xff] }
0x2326   :  { %1710 = vrot.lane.b32.xlu1 %v1708_v42, %s2685_s1 }
0x238e   :  { %v1634_v43 = vpop.permute.xlu0 %1633 }
0x238f   :  { %1636 = vst.msk [vmem:[#allocation4] sm:$0xff] %vm79_vm0, %v1634_v43  ;;  %1637 = vst.msk [vmem:[#allocation3 + $0x20] sm:$0xff] %vm79_vm0, %v1634_v43 }
0x2396   :  { %v1639_v44 = vld [vmem:[#allocation4] sm:$0xff] }
0x2397   :  { %v1640_v45 = vpack.c.bf16 %v1639_v44, %v1639_v44  ;;  %v1957_v13 = vld [vmem:[#allocation3 + $0x20] sm:$0xff] }
0x2398   :  { %v1711_v18 = vpop.permute.xlu1 %1710 }
0x2399   :  { %2407 = vmatmul.mubr.msk.bf16.vlgmr.msra.gmra.mxu1 %vm79_vm0, %v1640_v45 }
0x239a   :  { %2422 = vmatprep.mubr.msk.bf16.mxu1 %vm2683_vm1, %v2682_v16 }
0x2459   :  { %v1694_v47 = vpop.f32.mrf.mxu1 }
0x245a   :  { %v1700_v24 = vadd.f32 %v1694_v47, %v1098_v46 }
0x245b   :  { %v2408_v48 = vpop.f32.mrf.mxu1 }
0x245c   :  { %2594 = vtanh.f32 %v1700_v24  ;;  %v2192_v53 = vmul.f32 -1.442695, %v1700_v24 }
0x245d   :  { %v1697_v49 = vpop.f32.mrf.mxu1 }
0x245e   :  { %2596 = vpow2.f32 %v2192_v53  ;;  %v2488_v49 = vld [vmem:[%s3262_s5 + $0x8] sm:$0xff]  }
0x245f   :  { %v2409_v50 = vpop.f32.mrf.mxu1  ;;  %2419 = vmatpush3.bf16.msra.mxu1 %v2488_v49 }
0x2460   :  { %v2489_v50 = vld [vmem:[%s3262_s5] sm:$0xff]   ;;  %2420 = vmatprep.subr.bf16.mxu1 %v2682_v16  ;;  %v1106_v16 = vadd.f32 %v3088_v17, %v3038_v21  ;;  %s2687_s5 = smov [#allocation8]  }
0x2463   :  { %2421 = vmatpush3.bf16.msra.mxu1 %v2489_v50 }
0x2469   :  { %v2595_v51 = vpop.eup %2594 }
0x246a   :  { %1715 = vrot.lane.b32.xlu0 %v2595_v51, %s2684_s3 }
0x246b   :  { %v2597_v54 = vpop.eup %2596 }
0x246c   :  { %v1704_v55 = vadd.f32 1.0, %v2597_v54 }
0x246e   :  { %2598 = vrcp.f32 %v1704_v55 }
0x247b   :  { %v2599_v56 = vpop.eup %2598 }
0x247c   :  { %v1713_v59 = vmul.f32 %v2599_v56, %v1711_v18 }
0x24dc   :  { %v1716_v57 = vpop.permute.xlu0 %1715 }
0x24dd   :  { %v1718_v58 = vmul.f32 %v2599_v56, %v1716_v57 }
0x24df   :  { %1720 = vrot.lane.b32.xlu0 %v1718_v58, %s2685_s1 }
0x2551   :  { %v1721_v60 = vpop.permute.xlu0 %1720 }
0x2552   :  { %v1723_v61 = vadd.f32 %v1721_v60, %v1713_v59 }
0x2554   :  { %2600 = vtanh.f32 %v1723_v61 }
0x2561   :  { %v2601_v62 = vpop.eup %2600 }
0x2562   :  { %1726 = vrot.lane.b32.xlu1 %v2601_v62, %s2684_s3 }
0x2566   :  { %1731 = vrot.lane.b32.xlu1 %v1723_v61, %s2686_s19 }
0x25d4   :  { %v1727_v35 = vpop.permute.xlu1 %1726 }
0x25d5   :  { %v1729_v32 = vmul.f32 %v2599_v56, %v1727_v35 }
0x25d7   :  { %1736 = vrot.lane.b32.xlu0 %v1729_v32, %s2685_s1 }
0x25d8   :  { %v1732_v1 = vpop.permute.xlu1 %1731 }
0x25d9   :  { %1734 = vst.msk [vmem:[#allocation5] sm:$0xff] %vm79_vm0, %v1732_v1 }
0x25e0   :  { %v1811_v2 = vld [vmem:[#allocation5] sm:$0xff] }
0x25e1   :  { %1813 = vrot.lane.b32.xlu1 %v1811_v2, %s2685_s1 }
0x2649   :  { %v1737_v3 = vpop.permute.xlu0 %1736 }
0x264a   :  { %1739 = vst.msk [vmem:[#allocation4] sm:$0xff] %vm79_vm0, %v1737_v3  ;;  %1740 = vst.msk [vmem:[#allocation3 + $0x28] sm:$0xff] %vm79_vm0, %v1737_v3 }
0x2651   :  { %v1742_v5 = vld [vmem:[#allocation4] sm:$0xff]  ;;  %v1958_v10 = vld [vmem:[#allocation3 + $0x28] sm:$0xff] }
0x2652   :  { %v1743_v6 = vpack.c.bf16 %v1742_v5, %v1742_v5  ;;  %v1963_v20 = vpack.c.bf16 %v1958_v10, %v1957_v13 }
0x2653   :  { %v1814_v45 = vpop.permute.xlu1 %1813 }
0x2654   :  { %2415 = vmatmul.mubr.msk.bf16.vlgmr.msra.gmra.mxu0 %vm79_vm0, %v1743_v6 }
0x2655   :  { %2427 = vmatpush3.bf16.msra.mxu0 %v2486_v0  ;;  %2430 = vmatprep.mubr.msk.bf16.mxu0 %vm79_vm0, %v1961_v31 }
0x2656   :  { %2428 = vmatprep.subr.bf16.mxu0 %v2487_v8 }
0x2659   :  { %2429 = vmatpush3.bf16.msra.mxu0 %v2487_v8 }
0x265c   :  { %2431 = vmatmul.mubr.msk.bf16.vlgmr.msra.gmra.mxu0 %vm79_vm0, %v1962_v12 }
0x265d   :  { %2434 = vmatprep.mubr.msk.bf16.mxu0 %vm79_vm0, %v1963_v20 }
0x2714   :  { %v1797_v23 = vpop.f32.mrf.mxu0 }
0x2715   :  { %v1803_v26 = vadd.f32 %v1797_v23, %v1103_v22 }
0x2716   :  { %v2416_v27 = vpop.f32.mrf.mxu0 }
0x2717   :  { %2602 = vtanh.f32 %v1803_v26  ;;  %v2196_v28 = vmul.f32 -1.442695, %v1803_v26 }
0x2718   :  { %v1800_v29 = vpop.f32.mrf.mxu0 }
0x2719   :  { %2604 = vpow2.f32 %v2196_v28 }
0x271a   :  { %v2417_v30 = vpop.f32.mrf.mxu0 }
0x271c   :  { %v2432_v34 = vpop.f32.mrf.mxu0 }
0x271d   :  { %v2043_v15 = vadd.f32 %v2432_v34, %v3191_v33 }
0x271e   :  { %v2034_v36 = vpop.f32.mrf.mxu0 }
0x271f   :  { %2068 = vst.msk [vmem:[#allocation6 + $0x10] sm:$0xff] %vm2065_vm2, %v2043_v15  ;;  %v2035_v14 = vadd.f32 %v3191_v33, %v2034_v36 }
0x2720   :  { %v2433_v37 = vpop.f32.mrf.mxu0 }
0x2721   :  { %2066 = vst.msk [vmem:[#allocation6] sm:$0xff] %vm2065_vm2, %v2035_v14  ;;  %v2046_v38 = vadd.f32 %v2433_v37, %v3191_v33 }
0x2722   :  { %v2037_v39 = vpop.f32.mrf.mxu0 }
0x2723   :  { %2069 = vst.msk [vmem:[#allocation6 + $0x18] sm:$0xff] %vm2065_vm2, %v2046_v38  ;;  %v2038_v19 = vadd.f32 %v3191_v33, %v2037_v39 }
0x2724   :  { %v2603_v40 = vpop.eup %2602 }
0x2725   :  { %2067 = vst.msk [vmem:[#allocation6 + $0x8] sm:$0xff] %vm2065_vm2, %v2038_v19  ;;  %1818 = vrot.lane.b32.xlu0 %v2603_v40, %s2684_s3 }
0x2726   :  { %v2605_v41 = vpop.eup %2604 }
0x2727   :  { %v1807_v25 = vadd.f32 1.0, %v2605_v41 }
0x2729   :  { %2606 = vrcp.f32 %v1807_v25 }
0x2736   :  { %v2607_v42 = vpop.eup %2606 }
0x2737   :  { %v1816_v46 = vmul.f32 %v2607_v42, %v1814_v45 }
0x2797   :  { %v1819_v43 = vpop.permute.xlu0 %1818 }
0x2798   :  { %v1821_v44 = vmul.f32 %v2607_v42, %v1819_v43 }
0x279a   :  { %1823 = vrot.lane.b32.xlu0 %v1821_v44, %s2685_s1 }
0x280c   :  { %v1824_v47 = vpop.permute.xlu0 %1823 }
0x280d   :  { %v1826_v24 = vadd.f32 %v1824_v47, %v1816_v46 }
0x280f   :  { %2608 = vtanh.f32 %v1826_v24 }
0x281c   :  { %v2609_v48 = vpop.eup %2608 }
0x281d   :  { %1829 = vrot.lane.b32.xlu1 %v2609_v48, %s2684_s3 }
0x2821   :  { %1834 = vrot.lane.b32.xlu1 %v1826_v24, %s2686_s19 }
0x288f   :  { %v1830_v51 = vpop.permute.xlu1 %1829 }
0x2890   :  { %v1832_v53 = vmul.f32 %v2607_v42, %v1830_v51 }
0x2892   :  { %1839 = vrot.lane.b32.xlu0 %v1832_v53, %s2685_s1 }
0x2893   :  { %v1835_v54 = vpop.permute.xlu1 %1834 }
0x2894   :  { %1837 = vst.msk [vmem:[#allocation5] sm:$0xff] %vm79_vm0, %v1835_v54 }
0x289b   :  { %v1914_v55 = vld [vmem:[#allocation5] sm:$0xff] }
0x289c   :  { %1916 = vrot.lane.b32.xlu1 %v1914_v55, %s2685_s1 }
0x2904   :  { %v1840_v56 = vpop.permute.xlu0 %1839 }
0x2905   :  { %1842 = vst.msk [vmem:[#allocation4] sm:$0xff] %vm79_vm0, %v1840_v56  ;;  %1843 = vst.msk [vmem:[#allocation3 + $0x30] sm:$0xff] %vm79_vm0, %v1840_v56 }
0x290c   :  { %v1845_v57 = vld [vmem:[#allocation4] sm:$0xff]  ;;  %v1959_v10 = vld [vmem:[#allocation3 + $0x30] sm:$0xff] }
0x290d   :  { %v1846_v58 = vpack.c.bf16 %v1845_v57, %v1845_v57 }
0x290e   :  { %v1917_v21 = vpop.permute.xlu1 %1916 }
0x290f   :  { %2423 = vmatmul.mubr.msk.bf16.vlgmr.msra.gmra.mxu1 %vm79_vm0, %v1846_v58 }
0x29cf   :  { %v1900_v18 = vpop.f32.mrf.mxu1 }
0x29d0   :  { %v1906_v59 = vadd.f32 %v1900_v18, %v1106_v16 }
0x29d1   :  { %v2424_v60 = vpop.f32.mrf.mxu1 }
0x29d2   :  { %2610 = vtanh.f32 %v1906_v59  ;;  %v2200_v52 = vmul.f32 -1.442695, %v1906_v59 }
0x29d3   :  { %v1903_v61 = vpop.f32.mrf.mxu1 }
0x29d4   :  { %2612 = vpow2.f32 %v2200_v52 }
0x29d5   :  { %v2425_v62 = vpop.f32.mrf.mxu1 }
0x29df   :  { %v2611_v63 = vpop.eup %2610 }
0x29e0   :  { %1921 = vrot.lane.b32.xlu0 %v2611_v63, %s2684_s3 }
0x29e1   :  { %v2613_v0 = vpop.eup %2612 }
0x29e2   :  { %v1910_v35 = vadd.f32 1.0, %v2613_v0 }
0x29e4   :  { %2614 = vrcp.f32 %v1910_v35 }
0x29f1   :  { %v2615_v32 = vpop.eup %2614 }
0x29f2   :  { %v1919_v17 = vmul.f32 %v2615_v32, %v1917_v21 }
0x2a52   :  { %v1922_v1 = vpop.permute.xlu0 %1921 }
0x2a53   :  { %v1924_v2 = vmul.f32 %v2615_v32, %v1922_v1 }
0x2a55   :  { %1926 = vrot.lane.b32.xlu0 %v1924_v2, %s2685_s1 }
0x2ac7   :  { %v1927_v3 = vpop.permute.xlu0 %1926 }
0x2ac8   :  { %v1929_v4 = vadd.f32 %v1927_v3, %v1919_v17 }
0x2aca   :  { %2616 = vtanh.f32 %v1929_v4 }
0x2ad7   :  { %v2617_v5 = vpop.eup %2616 }
0x2ad8   :  { %1932 = vrot.lane.b32.xlu1 %v2617_v5, %s2684_s3  ;;  %s2091_s3 = sshll.u32 %s2687_s5, 4  ;;  %s2092_s3 = int_to_ptr.vmem [resolvable:$true] %s2091_s3 }
0x2ad9   :  { %p2623_p1 = scmp.lt.s32.totalorder %s2092_s3, %s2092_s3 }
0x2adc   :  { %1937 = vrot.lane.b32.xlu1 %v1929_v4, %s2686_s19 }
0x2b4a   :  { %v1933_v6 = vpop.permute.xlu1 %1932 }
0x2b4b   :  { %v1935_v7 = vmul.f32 %v2615_v32, %v1933_v6 }
0x2b4d   :  { %1942 = vrot.lane.b32.xlu0 %v1935_v7, %s2685_s1  ;;  %s2618_s1 = scalar_lea.vmem %s2092_s3, 256 }
0x2b4e   :  { %v1938_v8 = vpop.permute.xlu1 %1937  ;;  %p2619_p0 = scmp.ne.s32.totalorder %s2092_s3, %s2618_s1  ;;  %p2624_p2 = scmp.lt.s32.totalorder %s2618_s1, %s2618_s1 }
0x2b4f   :  { %1940 = vst.msk [vmem:[#allocation5] sm:$0xff] %vm79_vm0, %v1938_v8 }
0x2b50   :  { %p2625_p3 = por %p2624_p2, %p2623_p1 }
0x2b52   :  { %p2626_p4 = pnand %p2625_p3, %p2619_p0 }
0x2b56   :  { %v1950_v31 = vld [vmem:[#allocation5] sm:$0xff] }
0x2b57   :  { %1952 = vst.msk [vmem:[#allocation10 + $0x8] sm:$0xff] %vm79_vm0, %v1950_v31 }
0x2bbf   :  { %v1943_v9 = vpop.permute.xlu0 %1942 }
0x2bc0   :  { %1945 = vst.msk [vmem:[#allocation4] sm:$0xff] %vm79_vm0, %v1943_v9  ;;  %1946 = vst.msk [vmem:[#allocation3 + $0x38] sm:$0xff] %vm79_vm0, %v1943_v9 }
0x2bc7   :  { %v1960_v11 = vld [vmem:[#allocation3 + $0x38] sm:$0xff]  ;;  %v1947_v12 = vld [vmem:[#allocation4] sm:$0xff] }
0x2bc8   :  { %v1964_v13 = vpack.c.bf16 %v1960_v11, %v1959_v10  ;;  %1949 = vst.msk [vmem:[#allocation8 + $0x8] sm:$0xff] %vm79_vm0, %v1947_v12 }
0x2bca   :  { %2435 = vmatmul.mubr.msk.bf16.gmra.mxu0 %vm79_vm0, %v1964_v13 }
0x2bcb   :  { %2629 = shalt.err (!%p2626_p4)
}
0x2bcc   :  { %s2688_s19 = smov 128   ;;  %s2689_s14 = smov 8  }
0x2bcd   :  { %2097 = dma.vmem_to_hbm [thread:$0]  %s2092_s3, 256, %s3269_s12, [#allocation9], %s2688_s19, %s2688_s19, %s2689_s14  }
0x2bce   :  { %s2690_s16 = smov [#allocation10]  }
0x2bcf   :  { %s2103_s17 = sshll.u32 %s2690_s16, 4  ;;  %s2104_s17 = int_to_ptr.vmem [resolvable:$true] %s2103_s17 }
0x2bd0   :  { %s2638_s18 = scalar_lea.vmem %s2104_s17, 256  ;;  %p2643_p6 = scmp.lt.s32.totalorder %s2104_s17, %s2104_s17 }
0x2bd1   :  { %p2639_p5 = scmp.ne.s32.totalorder %s2104_s17, %s2638_s18  ;;  %p2644_p7 = scmp.lt.s32.totalorder %s2638_s18, %s2638_s18 }
0x2bd3   :  { %p2645_p8 = por %p2644_p7, %p2643_p6 }
0x2bd5   :  { %p2646_p9 = pnand %p2645_p8, %p2639_p5 }
0x2bd7   :  { %2649 = shalt.err (!%p2646_p9)
}
0x2bd8   :  { %2109 = dma.vmem_to_hbm [thread:$0]  %s2104_s17, 256, %s3270_s13, [#allocation9], %s2688_s19, %s2688_s19, %s2689_s14  }
0x2bd9   :  { %s2691_s12 = smov [#allocation6]  }
0x2bda   :  { %s2079_s22 = sshll.u32 %s2691_s12, 4  ;;  %s2080_s22 = int_to_ptr.vmem [resolvable:$true] %s2079_s22 }
0x2bdb   :  { %s2658_s13 = scalar_lea.vmem %s2080_s22, 1024  ;;  %p2663_p11 = scmp.lt.s32.totalorder %s2080_s22, %s2080_s22 }
0x2bdc   :  { %p2659_p10 = scmp.ne.s32.totalorder %s2080_s22, %s2658_s13  ;;  %p2664_p12 = scmp.lt.s32.totalorder %s2658_s13, %s2658_s13 }
0x2bde   :  { %p2665_p13 = por %p2664_p12, %p2663_p11 }
0x2be0   :  { %p2666_p0 = pnand %p2665_p13, %p2659_p10 }
0x2c8a   :  { %v2436_v20 = vpop.f32.mrf.mxu0 }
0x2c8b   :  { %v2059_v22 = vadd.f32 %v2436_v20, %v3191_v33 }
0x2c8c   :  { %v2050_v23 = vpop.f32.mrf.mxu0 }
0x2c8d   :  { %2072 = vst.msk [vmem:[#allocation6 + $0x30] sm:$0xff] %vm2065_vm2, %v2059_v22  ;;  %v2051_v26 = vadd.f32 %v3191_v33, %v2050_v23 }
0x2c8e   :  { %v2437_v27 = vpop.f32.mrf.mxu0 }
0x2c8f   :  { %2070 = vst.msk [vmem:[#allocation6 + $0x20] sm:$0xff] %vm2065_vm2, %v2051_v26  ;;  %v2062_v29 = vadd.f32 %v2437_v27, %v3191_v33 }
0x2c90   :  { %v2053_v30 = vpop.f32.mrf.mxu0 }
0x2c91   :  { %2073 = vst.msk [vmem:[#allocation6 + $0x38] sm:$0xff] %vm2065_vm2, %v2062_v29  ;;  %v2054_v34 = vadd.f32 %v3191_v33, %v2053_v30 }
0x2c93   :  { %2071 = vst.msk [vmem:[#allocation6 + $0x28] sm:$0xff] %vm2065_vm2, %v2054_v34 }
0x2c94   :  { %2669 = shalt.err (!%p2666_p0)
}
0x2c95   :  { %2085 = dma.vmem_to_hbm [thread:$0]  %s2080_s22, 1024, %s3268_s11, [#allocation7], %s2688_s19, %s2688_s19, %s2689_s14  }
0x2c96   :  { %2678 = dma.done.wait [#allocation7], 1024  }
0x2c97   :  { %2679 = vsyncadd [#allocation7], 4294966272 }
0x2c98   :  { %2680 = dma.done.wait [#allocation9], 512  }
0x2c99   :  { %2681 = vsyncadd [#allocation9], 4294966784 }
0x2c9a   :  { %2119 = vsyncpa [#allocation7], 1 }
0x2c9b   :  { %2120 = vsyncpa [#allocation9], 1 }

</bundles_post_ra>
